<compile_context>
chip_gen: v7x
topology: tpu7x:2x2x1
jax: 0.10.0
libtpu: 0.0.40
codegen_flags: <defaults>
</compile_context>

<pallas_src>
import jax
import jax.numpy as jnp
from jax.experimental import pallas as pl
from jax.experimental.pallas import tpu as pltpu


NEG_SLOPE = 0.2      # GATConv default negative_slope
NEG_INF = -1e30      # additive mask for non-edges


def _bmm(a, b):
    """Head-batched MXU matmul: [H, M, K] x [H, K, N] -> [H, M, N]."""
    return jax.lax.dot_general(
        a, b,
        dimension_numbers=(((2,), (1,)), ((0,), (0,))),
        preferred_element_type=jnp.float32)


def fused_gat_kernel(x_ref, bias_ref,
                     w1_ref, a1_ref, hm1_ref, b1_ref,
                     w2_ref, a2_ref, hm2_ref, stk2_ref, b2_ref,
                     out_ref):
    heads = hm1_ref.shape[0]
    x = x_ref[...]                                  # [N, Fin]
    mask = bias_ref[...][None, :, :]                # [1, N, N] additive (0 / -inf)

    def attention(h, a_ref):
        # One flat matmul for all per-head dst/src logits: [N, Din] x [Din, 2H]
        alpha = jnp.dot(h, a_ref[...], preferred_element_type=jnp.float32)  # [N, 2H]
        alpha_t = alpha.T                           # tiny [2H, N] transpose
        dst = alpha_t[:heads][:, :, None]           # [H, N, 1]
        src = alpha_t[heads:][:, None, :]           # [H, 1, N]
        e = dst + src                               # [H, N_dst, N_src]
        e = jnp.where(e >= 0.0, e, NEG_SLOPE * e)   # LeakyReLU
        e = e + mask                                # single additive edge mask
        m = jnp.max(e, axis=-1, keepdims=True)
        p = jnp.exp(e - m)                          # masked entries -> 0
        s = jnp.sum(p, axis=-1, keepdims=True)      # >= 1 (self loops)
        return p * pl.reciprocal(s, approx=True)    # [H, N, N], EUP divide

    def aggregate(att, h, w_ref, hm_ref):
        # One flat projection; per-head column selection via 0/1 lane mask.
        xh = jnp.dot(h, w_ref[...], preferred_element_type=jnp.float32)  # [N, H*C]
        xh_wide = xh[None, :, :] * hm_ref[...]                           # [H, N, H*C]
        return jnp.sum(_bmm(att, xh_wide), axis=0)                       # [N, H*C]

    # ---- layer 1: heads concatenated -> hidden_channels, bias, ReLU ----
    att1 = attention(x, a1_ref)                     # [H, N, N]
    h1 = aggregate(att1, x, w1_ref, hm1_ref)        # [N, H*C1] (lane-dense concat)
    h1 = jnp.maximum(h1 + b1_ref[...], 0.0)

    # ---- layer 2 (last): concat=False -> mean over heads (in stk2), bias ----
    att2 = attention(h1, a2_ref)                    # [H, N, N]
    o2 = aggregate(att2, h1, w2_ref, hm2_ref)       # [N, H*C2]
    out = jnp.dot(o2, stk2_ref[...],
                  preferred_element_type=jnp.float32) + b2_ref[...]      # [N, C2]
    out_ref[...] = out


def prepare_params(params):
    """One-time host-side weight folding (hoisted out of the forward call)."""
    heads, c1, c2 = params["heads"], params["c1"], params["c2"]

    def fold_attention_vectors(w, a_dst, a_src, cper):
        # A[:, h]   = W_h @ a_dst_h ;  A[:, H+h] = W_h @ a_src_h
        fin = w.shape[0]
        wh = w.reshape(fin, heads, cper)                       # [Fin, H, C]
        ad = jnp.einsum('fhc,hc->fh', wh, a_dst)               # [Fin, H]
        asrc = jnp.einsum('fhc,hc->fh', wh, a_src)             # [Fin, H]
        return jnp.concatenate([ad, asrc], axis=1)             # [Fin, 2H]

    def head_lane_mask(cper):
        lane_head = jnp.arange(heads * cper) // cper
        return (lane_head[None, None, :] ==
                jnp.arange(heads)[:, None, None]).astype(jnp.float32)  # [H,1,H*C]

    # vertical stack of identities, mean (1/H) folded in: [H*C2, C2]
    stk2 = jnp.tile(jnp.eye(c2, dtype=jnp.float32), (heads, 1)) / heads

    return dict(
        w1=params["w1"],
        a1=fold_attention_vectors(params["w1"], params["adst1"],
                                  params["asrc1"], c1),
        hm1=head_lane_mask(c1),
        b1=params["bias1"],
        w2=params["w2"],
        a2=fold_attention_vectors(params["w2"], params["adst2"],
                                  params["asrc2"], c2),
        hm2=head_lane_mask(c2),
        stk2=stk2,
        b2=params["bias2"],
    )


@jax.jit
def gat_forward(x, attn_bias, prepped):
    """k=2 GAT forward (eval mode), single fused gridless pallas_call."""
    n = x.shape[0]
    c_out = prepped["b2"].shape[-1]
    vmem = pl.BlockSpec(memory_space=pltpu.MemorySpace.VMEM)
    return pl.pallas_call(
        fused_gat_kernel,
        out_shape=jax.ShapeDtypeStruct((n, c_out), jnp.float32),
        in_specs=[vmem] * 11,
        out_specs=vmem,
    )(x, attn_bias,
      prepped["w1"], prepped["a1"], prepped["hm1"], prepped["b1"],
      prepped["w2"], prepped["a2"], prepped["hm2"], prepped["stk2"],
      prepped["b2"])


def edge_index_to_attn_bias(edge_index, n_nodes):
    """Additive attention bias: 0 for edges src->dst (+ self loops), -1e30 else.
    Note: duplicate edges in edge_index collapse to a single edge here (dense
    formulation), whereas PyG's edge-list softmax would count them twice."""
    src = edge_index[0]
    dst = edge_index[1]
    adj = jnp.zeros((n_nodes, n_nodes), jnp.float32)
    adj = adj.at[dst, src].set(1.0)
    idx = jnp.arange(n_nodes)
    adj = adj.at[idx, idx].set(1.0)                 # PyG add_self_loops=True
    return jnp.where(adj > 0.0, 0.0, NEG_INF)


if __name__ == "__main__":
    key = jax.random.PRNGKey(0)
    n_nodes = 16
    in_channels = 8
    hidden_channels = 32
    out_channels = 8
    n_heads = 8
    c1 = hidden_channels // n_heads        # per-head width, layer 0
    c2 = out_channels                      # per-head width, last layer

    keys = jax.random.split(key, 10)
    x = jax.random.normal(keys[0], (n_nodes, in_channels), jnp.float32)

    # deterministic small graph: ring edges + a few random edges
    ring_src = jnp.arange(n_nodes, dtype=jnp.int32)
    ring_dst = (ring_src + 1) % n_nodes
    rnd_src = jax.random.randint(keys[1], (16,), 0, n_nodes, jnp.int32)
    rnd_dst = (rnd_src + 1 +
               jax.random.randint(keys[2], (16,), 0, n_nodes - 1,
                                  jnp.int32)) % n_nodes
    edge_index = jnp.stack([jnp.concatenate([ring_src, rnd_src]),
                            jnp.concatenate([ring_dst, rnd_dst])], axis=0)
    attn_bias = edge_index_to_attn_bias(edge_index, n_nodes)

    # deterministic synthetic parameters (GATConv shapes); biases zero like PyG
    params = {
        "heads": n_heads,
        "c1": c1,
        "c2": c2,
        "w1": 0.2 * jax.random.normal(keys[3],
                                      (in_channels, n_heads * c1), jnp.float32),
        "asrc1": 0.2 * jax.random.normal(keys[4], (n_heads, c1), jnp.float32),
        "adst1": 0.2 * jax.random.normal(keys[5], (n_heads, c1), jnp.float32),
        "bias1": jnp.zeros((1, n_heads * c1), jnp.float32),
        "w2": 0.2 * jax.random.normal(keys[6],
                                      (hidden_channels, n_heads * c2),
                                      jnp.float32),
        "asrc2": 0.2 * jax.random.normal(keys[7], (n_heads, c2), jnp.float32),
        "adst2": 0.2 * jax.random.normal(keys[8], (n_heads, c2), jnp.float32),
        "bias2": jnp.zeros((1, c2), jnp.float32),
    }

    prepped = prepare_params(params)       # hoisted one-time weight folding
    out = gat_forward(x, attn_bias, prepped)
    out = jax.block_until_ready(out)
    assert out.shape == (n_nodes, out_channels)
    assert bool(jnp.all(jnp.isfinite(out)))
    print("KERNEL_OK")
</pallas_src>

<mosaic_0001>
module attributes {stable_mosaic.version = 11 : i64} {
  func.func @fused_gat_kernel(%arg0: memref<16x8xf32, #tpu.memory_space<vmem>>, %arg1: memref<16x16xf32, #tpu.memory_space<vmem>>, %arg2: memref<8x32xf32, #tpu.memory_space<vmem>>, %arg3: memref<8x16xf32, #tpu.memory_space<vmem>>, %arg4: memref<8x1x32xf32, #tpu.memory_space<vmem>>, %arg5: memref<1x32xf32, #tpu.memory_space<vmem>>, %arg6: memref<32x64xf32, #tpu.memory_space<vmem>>, %arg7: memref<32x16xf32, #tpu.memory_space<vmem>>, %arg8: memref<8x1x64xf32, #tpu.memory_space<vmem>>, %arg9: memref<64x8xf32, #tpu.memory_space<vmem>>, %arg10: memref<1x8xf32, #tpu.memory_space<vmem>>, %arg11: memref<16x8xf32, #tpu.memory_space<vmem>>) attributes {dimension_semantics = [], scalar_prefetch = 0 : i64, scratch_operands = 0 : i64, tpu.core_type = #tpu.core_type<tc>} {
    %c0 = arith.constant 0 : index
    %c0_0 = arith.constant 0 : index
    %0 = vector.load %arg0[%c0, %c0_0] : memref<16x8xf32, #tpu.memory_space<vmem>>, vector<16x8xf32>
    %c0_1 = arith.constant 0 : index
    %c0_2 = arith.constant 0 : index
    %1 = vector.load %arg1[%c0_1, %c0_2] : memref<16x16xf32, #tpu.memory_space<vmem>>, vector<16x16xf32>
    %2 = vector.shape_cast %1 : vector<16x16xf32> to vector<1x16x16xf32>
    %c0_3 = arith.constant 0 : index
    %c0_4 = arith.constant 0 : index
    %3 = vector.load %arg3[%c0_3, %c0_4] : memref<8x16xf32, #tpu.memory_space<vmem>>, vector<8x16xf32>
    %cst = arith.constant dense<0.000000e+00> : vector<16x16xf32>
    %4 = tpu.matmul %0, %3, %cst {dimension_numbers = #tpu.dot_dimension_numbers<[1], [0], [0], [1], [0, 0, 1, 1], [], []>} : vector<16x8xf32>, vector<8x16xf32>, vector<16x16xf32> -> vector<16x16xf32>
    %5 = tpu.transpose %4, [1, 0] : vector<16x16xf32> -> vector<16x16xf32>
    %6 = vector.extract_strided_slice %5 {offsets = [0, 0], sizes = [8, 16], strides = [1, 1]} : vector<16x16xf32> to vector<8x16xf32>
    %7 = vector.shape_cast %6 : vector<8x16xf32> to vector<8x16x1xf32>
    %8 = vector.extract_strided_slice %5 {offsets = [8, 0], sizes = [8, 16], strides = [1, 1]} : vector<16x16xf32> to vector<8x16xf32>
    %9 = vector.shape_cast %8 : vector<8x16xf32> to vector<8x1x16xf32>
    %10 = vector.broadcast %7 : vector<8x16x1xf32> to vector<8x16x16xf32>
    %11 = vector.broadcast %9 : vector<8x1x16xf32> to vector<8x16x16xf32>
    %12 = arith.addf %10, %11 : vector<8x16x16xf32>
    %cst_5 = arith.constant 0.000000e+00 : f32
    %13 = vector.broadcast %cst_5 : f32 to vector<8x16x16xf32>
    %14 = arith.cmpf oge, %12, %13 : vector<8x16x16xf32>
    %cst_6 = arith.constant 2.000000e-01 : f32
    %15 = vector.broadcast %cst_6 : f32 to vector<8x16x16xf32>
    %16 = arith.mulf %15, %12 : vector<8x16x16xf32>
    %17 = arith.select %14, %12, %16 : vector<8x16x16xi1>, vector<8x16x16xf32>
    %18 = vector.broadcast %2 : vector<1x16x16xf32> to vector<8x16x16xf32>
    %19 = arith.addf %17, %18 : vector<8x16x16xf32>
    %cst_7 = arith.constant dense<0xFF800000> : vector<8x16xf32>
    %20 = vector.multi_reduction <maximumf>, %19, %cst_7 [2] : vector<8x16x16xf32> to vector<8x16xf32>
    %21 = vector.shape_cast %20 : vector<8x16xf32> to vector<8x16x1xf32>
    %22 = vector.broadcast %21 : vector<8x16x1xf32> to vector<8x16x16xf32>
    %23 = arith.subf %19, %22 : vector<8x16x16xf32>
    %24 = math.exp %23 : vector<8x16x16xf32>
    %cst_8 = arith.constant dense<0.000000e+00> : vector<8x16xf32>
    %25 = vector.multi_reduction <add>, %24, %cst_8 [2] : vector<8x16x16xf32> to vector<8x16xf32>
    %26 = vector.shape_cast %25 : vector<8x16xf32> to vector<8x16x1xf32>
    %27 = tpu.reciprocal %26 {approx = true} : vector<8x16x1xf32> -> vector<8x16x1xf32>
    %28 = vector.broadcast %27 : vector<8x16x1xf32> to vector<8x16x16xf32>
    %29 = arith.mulf %24, %28 : vector<8x16x16xf32>
    %c0_9 = arith.constant 0 : index
    %c0_10 = arith.constant 0 : index
    %30 = vector.load %arg2[%c0_9, %c0_10] : memref<8x32xf32, #tpu.memory_space<vmem>>, vector<8x32xf32>
    %cst_11 = arith.constant dense<0.000000e+00> : vector<16x32xf32>
    %31 = tpu.matmul %0, %30, %cst_11 {dimension_numbers = #tpu.dot_dimension_numbers<[1], [0], [0], [1], [0, 0, 1, 1], [], []>} : vector<16x8xf32>, vector<8x32xf32>, vector<16x32xf32> -> vector<16x32xf32>
    %32 = vector.shape_cast %31 : vector<16x32xf32> to vector<1x16x32xf32>
    %c0_12 = arith.constant 0 : index
    %c0_13 = arith.constant 0 : index
    %c0_14 = arith.constant 0 : index
    %33 = vector.load %arg4[%c0_12, %c0_13, %c0_14] : memref<8x1x32xf32, #tpu.memory_space<vmem>>, vector<8x1x32xf32>
    %34 = vector.broadcast %32 : vector<1x16x32xf32> to vector<8x16x32xf32>
    %35 = vector.broadcast %33 : vector<8x1x32xf32> to vector<8x16x32xf32>
    %36 = arith.mulf %34, %35 : vector<8x16x32xf32>
    %cst_15 = arith.constant dense<0.000000e+00> : vector<8x16x32xf32>
    %37 = tpu.matmul %29, %36, %cst_15 {dimension_numbers = #tpu.dot_dimension_numbers<[2], [1], [1], [2], [0, 0, 0, 1, 1, 2], [0], [0]>} : vector<8x16x16xf32>, vector<8x16x32xf32>, vector<8x16x32xf32> -> vector<8x16x32xf32>
    %cst_16 = arith.constant dense<0.000000e+00> : vector<16x32xf32>
    %38 = vector.multi_reduction <add>, %37, %cst_16 [0] : vector<8x16x32xf32> to vector<16x32xf32>
    %c0_17 = arith.constant 0 : index
    %c0_18 = arith.constant 0 : index
    %39 = vector.load %arg5[%c0_17, %c0_18] : memref<1x32xf32, #tpu.memory_space<vmem>>, vector<1x32xf32>
    %40 = vector.broadcast %39 : vector<1x32xf32> to vector<16x32xf32>
    %41 = arith.addf %38, %40 : vector<16x32xf32>
    %cst_19 = arith.constant 0.000000e+00 : f32
    %42 = vector.broadcast %cst_19 : f32 to vector<16x32xf32>
    %43 = arith.maximumf %41, %42 : vector<16x32xf32>
    %c0_20 = arith.constant 0 : index
    %c0_21 = arith.constant 0 : index
    %44 = vector.load %arg7[%c0_20, %c0_21] : memref<32x16xf32, #tpu.memory_space<vmem>>, vector<32x16xf32>
    %cst_22 = arith.constant dense<0.000000e+00> : vector<16x16xf32>
    %45 = tpu.matmul %43, %44, %cst_22 {dimension_numbers = #tpu.dot_dimension_numbers<[1], [0], [0], [1], [0, 0, 1, 1], [], []>} : vector<16x32xf32>, vector<32x16xf32>, vector<16x16xf32> -> vector<16x16xf32>
    %46 = tpu.transpose %45, [1, 0] : vector<16x16xf32> -> vector<16x16xf32>
    %47 = vector.extract_strided_slice %46 {offsets = [0, 0], sizes = [8, 16], strides = [1, 1]} : vector<16x16xf32> to vector<8x16xf32>
    %48 = vector.shape_cast %47 : vector<8x16xf32> to vector<8x16x1xf32>
    %49 = vector.extract_strided_slice %46 {offsets = [8, 0], sizes = [8, 16], strides = [1, 1]} : vector<16x16xf32> to vector<8x16xf32>
    %50 = vector.shape_cast %49 : vector<8x16xf32> to vector<8x1x16xf32>
    %51 = vector.broadcast %48 : vector<8x16x1xf32> to vector<8x16x16xf32>
    %52 = vector.broadcast %50 : vector<8x1x16xf32> to vector<8x16x16xf32>
    %53 = arith.addf %51, %52 : vector<8x16x16xf32>
    %cst_23 = arith.constant 0.000000e+00 : f32
    %54 = vector.broadcast %cst_23 : f32 to vector<8x16x16xf32>
    %55 = arith.cmpf oge, %53, %54 : vector<8x16x16xf32>
    %cst_24 = arith.constant 2.000000e-01 : f32
    %56 = vector.broadcast %cst_24 : f32 to vector<8x16x16xf32>
    %57 = arith.mulf %56, %53 : vector<8x16x16xf32>
    %58 = arith.select %55, %53, %57 : vector<8x16x16xi1>, vector<8x16x16xf32>
    %59 = vector.broadcast %2 : vector<1x16x16xf32> to vector<8x16x16xf32>
    %60 = arith.addf %58, %59 : vector<8x16x16xf32>
    %cst_25 = arith.constant dense<0xFF800000> : vector<8x16xf32>
    %61 = vector.multi_reduction <maximumf>, %60, %cst_25 [2] : vector<8x16x16xf32> to vector<8x16xf32>
    %62 = vector.shape_cast %61 : vector<8x16xf32> to vector<8x16x1xf32>
    %63 = vector.broadcast %62 : vector<8x16x1xf32> to vector<8x16x16xf32>
    %64 = arith.subf %60, %63 : vector<8x16x16xf32>
    %65 = math.exp %64 : vector<8x16x16xf32>
    %cst_26 = arith.constant dense<0.000000e+00> : vector<8x16xf32>
    %66 = vector.multi_reduction <add>, %65, %cst_26 [2] : vector<8x16x16xf32> to vector<8x16xf32>
    %67 = vector.shape_cast %66 : vector<8x16xf32> to vector<8x16x1xf32>
    %68 = tpu.reciprocal %67 {approx = true} : vector<8x16x1xf32> -> vector<8x16x1xf32>
    %69 = vector.broadcast %68 : vector<8x16x1xf32> to vector<8x16x16xf32>
    %70 = arith.mulf %65, %69 : vector<8x16x16xf32>
    %c0_27 = arith.constant 0 : index
    %c0_28 = arith.constant 0 : index
    %71 = vector.load %arg6[%c0_27, %c0_28] : memref<32x64xf32, #tpu.memory_space<vmem>>, vector<32x64xf32>
    %cst_29 = arith.constant dense<0.000000e+00> : vector<16x64xf32>
    %72 = tpu.matmul %43, %71, %cst_29 {dimension_numbers = #tpu.dot_dimension_numbers<[1], [0], [0], [1], [0, 0, 1, 1], [], []>} : vector<16x32xf32>, vector<32x64xf32>, vector<16x64xf32> -> vector<16x64xf32>
    %73 = vector.shape_cast %72 : vector<16x64xf32> to vector<1x16x64xf32>
    %c0_30 = arith.constant 0 : index
    %c0_31 = arith.constant 0 : index
    %c0_32 = arith.constant 0 : index
    %74 = vector.load %arg8[%c0_30, %c0_31, %c0_32] : memref<8x1x64xf32, #tpu.memory_space<vmem>>, vector<8x1x64xf32>
    %75 = vector.broadcast %73 : vector<1x16x64xf32> to vector<8x16x64xf32>
    %76 = vector.broadcast %74 : vector<8x1x64xf32> to vector<8x16x64xf32>
    %77 = arith.mulf %75, %76 : vector<8x16x64xf32>
    %cst_33 = arith.constant dense<0.000000e+00> : vector<8x16x64xf32>
    %78 = tpu.matmul %70, %77, %cst_33 {dimension_numbers = #tpu.dot_dimension_numbers<[2], [1], [1], [2], [0, 0, 0, 1, 1, 2], [0], [0]>} : vector<8x16x16xf32>, vector<8x16x64xf32>, vector<8x16x64xf32> -> vector<8x16x64xf32>
    %cst_34 = arith.constant dense<0.000000e+00> : vector<16x64xf32>
    %79 = vector.multi_reduction <add>, %78, %cst_34 [0] : vector<8x16x64xf32> to vector<16x64xf32>
    %c0_35 = arith.constant 0 : index
    %c0_36 = arith.constant 0 : index
    %80 = vector.load %arg9[%c0_35, %c0_36] : memref<64x8xf32, #tpu.memory_space<vmem>>, vector<64x8xf32>
    %cst_37 = arith.constant dense<0.000000e+00> : vector<16x8xf32>
    %81 = tpu.matmul %79, %80, %cst_37 {dimension_numbers = #tpu.dot_dimension_numbers<[1], [0], [0], [1], [0, 0, 1, 1], [], []>} : vector<16x64xf32>, vector<64x8xf32>, vector<16x8xf32> -> vector<16x8xf32>
    %c0_38 = arith.constant 0 : index
    %c0_39 = arith.constant 0 : index
    %82 = vector.load %arg10[%c0_38, %c0_39] : memref<1x8xf32, #tpu.memory_space<vmem>>, vector<1x8xf32>
    %83 = vector.broadcast %82 : vector<1x8xf32> to vector<16x8xf32>
    %84 = arith.addf %81, %83 : vector<16x8xf32>
    %c0_40 = arith.constant 0 : index
    %c0_41 = arith.constant 0 : index
    %85 = vector.load %arg11[%c0_40, %c0_41] : memref<16x8xf32, #tpu.memory_space<vmem>>, vector<16x8xf32>
    tpu.vector_store %arg11[%c0_40, %c0_41], %84 {strides = array<i32>} : memref<16x8xf32, #tpu.memory_space<vmem>>, vector<16x8xf32>,
    return
  }
}

</mosaic_0001>

<bundles_post_ra>
// kernel: gat_forward.1
= control target key start
LH: loop header
LB: loop body
LE: loop exit
PB: predicated region body
PF: predicated region fallthrough
CT: control target
= control target key end

     0   :  { %vm43_vm0 = vcmask 64512   ;;  %v157_v5 = vlaneseq  ;;  %v3456_v25 = vmov 1966171168   ;;  %vm415_vm3 = vcmask 130048   ;;  %s4215_s3 = inlined_call_operand.vmem [shape: f32[8,16], index: 3, kind: input, shape index: {}]   ;;  %s4216_s0 = inlined_call_operand.vmem [shape: f32[16,8], index: 0, kind: input, shape index: {}]   ;;  %s4217_s2 = inlined_call_operand.vmem [shape: f32[8,32], index: 2, kind: input, shape index: {}]   ;;  %s4218_s1 = inlined_call_operand.vmem [shape: f32[16,16], index: 1, kind: input, shape index: {}]   ;;  %s4219_s4 = inlined_call_operand.vmem [shape: f32[8,1,32], index: 4, kind: input, shape index: {}]   ;;  %s4220_s7 = inlined_call_operand.vmem [shape: f32[32,16], index: 7, kind: input, shape index: {}]   ;;  %s4221_s6 = inlined_call_operand.vmem [shape: f32[32,64], index: 6, kind: input, shape index: {}]   ;;  %s4222_s5 = inlined_call_operand.vmem [shape: f32[1,32], index: 5, kind: input, shape index: {}]   ;;  %s4223_s8 = inlined_call_operand.vmem [shape: f32[8,1,64], index: 8, kind: input, shape index: {}]   ;;  %s4224_s9 = inlined_call_operand.vmem [shape: f32[64,8], index: 9, kind: input, shape index: {}]   ;;  %s4225_s10 = inlined_call_operand.vmem [shape: f32[1,8], index: 10, kind: input, shape index: {}]   ;;  %s4226_s11 = inlined_call_operand.vmem [shape: f32[16,8], index: 11, kind: output, shape index: {}]  }
   0x1   :  { %v42_v0 = vld [vmem:[%s4215_s3] sm:$0xff]  ;;  %v39_v2 = vld [vmem:[%s4216_s0 + $0x8] sm:$0xff]  ;;  %v248_v26 = vunpack.c.l.s4 %v3456_v25 }
   0x2   :  { %v38_v1 = vld [vmem:[%s4216_s0] sm:$0xff]  ;;  %3065 = vmatprep.subr.mxu0 %v42_v0  ;;  %v3529_v6 = vshrl.u32 %v157_v5, 7  ;;  %v3579_v50 = vld [vmem:[%s4218_s1 + $0x8] sm:$0xff] }
   0x3   :  { %3067 = vmatprep.mubr.msk.f32.mxu0 %vm43_vm0, %v38_v1  ;;  %3066 = vmatpush3.msra.mxu0 %v42_v0  ;;  %v592_v24 = vld [vmem:[%s4217_s2] sm:$0xff]  ;;  %v249_v27 = vunpack.c.0.s8 %v248_v26 }
   0x4   :  { %3072 = vmatprep.mubr.msk.f32.mxu1 %vm43_vm0, %v38_v1  ;;  %3068 = vmatmul.mubr.msk.f32.vlgmr.msra.gmra.mrb[0].mxu0 %vm43_vm0, %v39_v2  ;;  %v3532_v7 = vsub.s32 0, %v3529_v6  ;;  %v170_v8 = vsub.s32 1, %v3529_v6  ;;  %v236_v12 = vsub.s32 7, %v3529_v6  ;;  %v181_v14 = vsub.s32 2, %v3529_v6  ;;  %v3571_v40 = vld [vmem:[%s4218_s1] sm:$0xff] }
   0x5   :  { %v192_v16 = vsub.s32 3, %v3529_v6  ;;  %v203_v18 = vsub.s32 4, %v3529_v6  ;;  %v214_v20 = vsub.s32 5, %v3529_v6  ;;  %v225_v22 = vsub.s32 6, %v3529_v6  ;;  %3070 = vmatprep.subr.mxu1 %v592_v24 }
   0x6   :  { %3071 = vmatpush3.msra.mxu1 %v592_v24  ;;  %v3561_v28 = vsub.s32 %v249_v27, %v3529_v6 }
   0x7   :  { %3073 = vmatmul.mubr.msk.f32.vlgmr.msra.gmra.mrb[0].mxu1 %vm43_vm0, %v39_v2 }
  0xd7   :  { %v3069_v3 = vpop.f32.mrb[0].mxu0 }
  0xd8   :  { %v116_v4 = vpop.f32.mrb[1].mxu0 }
  0xd9   :  { %125 = vxpose.xlu0.b32.start [1/2] (short) (narrow) %v116_v4, 16 }
  0xdd   :  { %126 = vxpose.xlu0.b32.end [2/2] (short) (narrow) %v3069_v3, 16 }
 0x159   :  { %v141_v9 = vpop.trf.xlu0 }
 0x15a   :  { %v171_v10 = vrot.slane %v141_v9, %v170_v8  ;;  %v160_v11 = vrot.slane %v141_v9, %v3532_v7  ;;  %v237_v13 = vrot.slane %v141_v9, %v236_v12  ;;  %v182_v15 = vrot.slane %v141_v9, %v181_v14 }
 0x15b   :  { %v193_v17 = vrot.slane %v141_v9, %v192_v16  ;;  %v204_v19 = vrot.slane %v141_v9, %v203_v18  ;;  %v215_v21 = vrot.slane %v141_v9, %v214_v20  ;;  %v226_v23 = vrot.slane %v141_v9, %v225_v22 }
 0x15c   :  { %173 = vbcast.lane.b32.xlu0 %v171_v10, 256  ;;  %162 = vbcast.lane.b32.xlu1 %v160_v11, 256 }
 0x15d   :  { %v142_v29 = vpop.trf.xlu0 }
 0x15e   :  { %v253_v30 = vrot.slane %v142_v29, %v3561_v28  ;;  %v246_v5 = vcombine.high %v142_v29, %v142_v29 }
 0x160   :  { %239 = vbcast.lane.b32.xlu0 %v237_v13, 256  ;;  %166 = vbcast.lane.b32.xlu1 %v160_v11, 264  ;;  %v261_v31 = vcombine.high %v253_v30, %v253_v30  ;;  %v269_v32 = vrot.slane %v253_v30, %v3561_v28 }
 0x162   :  { %v283_v33 = vrot.slane %v261_v31, %v3561_v28  ;;  %v298_v34 = vrot.slane %v269_v32, %v3532_v7  ;;  %v291_v46 = vcombine.high %v269_v32, %v269_v32 }
 0x164   :  { %177 = vbcast.lane.b32.xlu1 %v171_v10, 264  ;;  %v302_v35 = vrot.slane %v283_v33, %v3532_v7  ;;  %v306_v55 = vrot.slane %v291_v46, %v3532_v7  ;;  %v293_v0 = vcombine.high %v283_v33, %v283_v33 }
 0x166   :  { %v310_v10 = vrot.slane %v293_v0, %v3532_v7 }
 0x168   :  { %184 = vbcast.lane.b32.xlu1 %v182_v15, 256 }
 0x16c   :  { %188 = vbcast.lane.b32.xlu1 %v182_v15, 264 }
 0x170   :  { %195 = vbcast.lane.b32.xlu1 %v193_v17, 256 }
 0x174   :  { %199 = vbcast.lane.b32.xlu1 %v193_v17, 264 }
 0x178   :  { %206 = vbcast.lane.b32.xlu1 %v204_v19, 256 }
 0x17c   :  { %210 = vbcast.lane.b32.xlu1 %v204_v19, 264 }
 0x180   :  { %217 = vbcast.lane.b32.xlu1 %v215_v21, 256 }
 0x184   :  { %221 = vbcast.lane.b32.xlu1 %v215_v21, 264  ;;  %v260_v21 = vrot.slane %v246_v5, %v3561_v28 }
 0x186   :  { %v276_v27 = vrot.slane %v260_v21, %v3561_v28  ;;  %v262_v31 = vcombine.high %v260_v21, %v260_v21 }
 0x188   :  { %228 = vbcast.lane.b32.xlu1 %v226_v23, 256 }
 0x18c   :  { %232 = vbcast.lane.b32.xlu1 %v226_v23, 264 }
 0x190   :  { %243 = vbcast.lane.b32.xlu1 %v237_v13, 264 }
 0x1ce   :  { %v163_v36 = vpop.permute.xlu1 %162  ;;  %v174_v37 = vpop.permute.xlu0 %173 }
 0x1cf   :  { %v335_v38 = vadd.f32 %v298_v34, %v163_v36  ;;  %v337_v39 = vadd.f32 %v302_v35, %v174_v37  ;;  %v314_v36 = vrot.slane %v276_v27, %v3532_v7 }
 0x1d1   :  { %v367_v41 = vmul.f32 0.2, %v335_v38  ;;  %vm353_vm1 = vcmp.ge.f32.partialorder %v337_v39, 0.0  ;;  %v369_v42 = vmul.f32 0.2, %v337_v39  ;;  %vm351_vm2 = vcmp.ge.f32.partialorder %v335_v38, 0.0 }
 0x1d2   :  { %v167_v43 = vpop.permute.xlu1 %166 }
 0x1d3   :  { %v336_v44 = vadd.f32 %v298_v34, %v167_v43  ;;  %v383_v45 = vsel %vm351_vm2, %v335_v38, %v367_v41  ;;  %v385_v47 = vsel %vm353_vm1, %v337_v39, %v369_v42  ;;  %v290_v39 = vrot.slane %v262_v31, %v3561_v28 }
 0x1d4   :  { %v3574_v48 = vadd.f32 %v383_v45, %v3571_v40  ;;  %v3584_v53 = vadd.f32 %v385_v47, %v3571_v40 }
 0x1d5   :  { %v368_v49 = vmul.f32 0.2, %v336_v44  ;;  %vm352_vm4 = vcmp.ge.f32.partialorder %v336_v44, 0.0  ;;  %v294_v47 = vcombine.high %v290_v39, %v290_v39 }
 0x1d6   :  { %v178_v51 = vpop.permute.xlu1 %177  ;;  %v416_v52 = vsel %vm415_vm3, %v3574_v48, -inf  ;;  %v422_v61 = vsel %vm415_vm3, %v3584_v53, -inf }
 0x1d7   :  { %v338_v54 = vadd.f32 %v302_v35, %v178_v51  ;;  %417 = vmax.xlane.f32.xlu0 %v416_v52  ;;  %v384_v56 = vsel %vm352_vm4, %v336_v44, %v368_v49  ;;  %vm1388_vm4 = vcmask 261120  }
 0x1d8   :  { %v3588_v57 = vadd.f32 %v384_v56, %v3579_v50 }
 0x1d9   :  { %v370_v58 = vmul.f32 0.2, %v338_v54  ;;  %vm354_vm5 = vcmp.ge.f32.partialorder %v338_v54, 0.0 }
 0x1da   :  { %v185_v59 = vpop.permute.xlu1 %184  ;;  %v419_v60 = vsel %vm415_vm3, %v3588_v57, -inf }
 0x1db   :  { %v339_v62 = vadd.f32 %v306_v55, %v185_v59  ;;  %420 = vmax.xlane.f32.xlu1 %v419_v60  ;;  %423 = vmax.xlane.f32.xlu0 %v422_v61  ;;  %v386_v63 = vsel %vm354_vm5, %v338_v54, %v370_v58  ;;  %v326_v59 = vrot.slane %v294_v47, %v3532_v7 }
 0x1dc   :  { %v3595_v1 = vadd.f32 %v386_v63, %v3579_v50 }
 0x1dd   :  { %v371_v2 = vmul.f32 0.2, %v339_v62  ;;  %vm355_vm6 = vcmp.ge.f32.partialorder %v339_v62, 0.0 }
 0x1de   :  { %v189_v3 = vpop.permute.xlu1 %188  ;;  %v425_v4 = vsel %vm415_vm3, %v3595_v1, -inf }
 0x1df   :  { %v340_v9 = vadd.f32 %v306_v55, %v189_v3  ;;  %426 = vmax.xlane.f32.xlu0 %v425_v4  ;;  %v387_v11 = vsel %vm355_vm6, %v339_v62, %v371_v2  ;;  %v318_v55 = vrot.slane %v290_v39, %v3532_v7  ;;  %v240_v62 = vpop.permute.xlu0 %239  ;;  %v292_v2 = vcombine.high %v276_v27, %v276_v27 }
 0x1e0   :  { %v3601_v13 = vadd.f32 %v387_v11, %v3571_v40  ;;  %v349_v5 = vadd.f32 %v326_v59, %v240_v62 }
 0x1e1   :  { %v372_v15 = vmul.f32 0.2, %v340_v9  ;;  %vm356_vm7 = vcmp.ge.f32.partialorder %v340_v9, 0.0 }
 0x1e2   :  { %v196_v17 = vpop.permute.xlu1 %195  ;;  %v428_v19 = vsel %vm415_vm3, %v3601_v13, -inf  ;;  %vm365_vm14 = vcmp.ge.f32.partialorder %v349_v5, 0.0 }
 0x1e3   :  { %v341_v23 = vadd.f32 %v310_v10, %v196_v17  ;;  %429 = vmax.xlane.f32.xlu0 %v428_v19  ;;  %v388_v24 = vsel %vm356_vm7, %v340_v9, %v372_v15  ;;  %v322_v17 = vrot.slane %v292_v2, %v3532_v7 }
 0x1e4   :  { %v3607_v25 = vadd.f32 %v388_v24, %v3579_v50 }
 0x1e5   :  { %v373_v26 = vmul.f32 0.2, %v341_v23  ;;  %vm357_vm8 = vcmp.ge.f32.partialorder %v341_v23, 0.0 }
 0x1e6   :  { %v200_v29 = vpop.permute.xlu1 %199  ;;  %v431_v30 = vsel %vm415_vm3, %v3607_v25, -inf }
 0x1e7   :  { %v342_v32 = vadd.f32 %v310_v10, %v200_v29  ;;  %432 = vmax.xlane.f32.xlu1 %v431_v30  ;;  %v389_v33 = vsel %vm357_vm8, %v341_v23, %v373_v26  ;;  %v381_v23 = vmul.f32 0.2, %v349_v5 }
 0x1e8   :  { %v3613_v34 = vadd.f32 %v389_v33, %v3571_v40 }
 0x1e9   :  { %v374_v35 = vmul.f32 0.2, %v342_v32  ;;  %vm358_vm9 = vcmp.ge.f32.partialorder %v342_v32, 0.0 }
 0x1ea   :  { %v207_v37 = vpop.permute.xlu1 %206  ;;  %v434_v38 = vsel %vm415_vm3, %v3613_v34, -inf }
 0x1eb   :  { %v343_v41 = vadd.f32 %v314_v36, %v207_v37  ;;  %435 = vmax.xlane.f32.xlu0 %v434_v38  ;;  %v390_v42 = vsel %vm358_vm9, %v342_v32, %v374_v35  ;;  %v397_v35 = vsel %vm365_vm14, %v349_v5, %v381_v23 }
 0x1ec   :  { %v3620_v43 = vadd.f32 %v390_v42, %v3579_v50 }
 0x1ed   :  { %v375_v44 = vmul.f32 0.2, %v343_v41  ;;  %vm359_vm10 = vcmp.ge.f32.partialorder %v343_v41, 0.0 }
 0x1ee   :  { %v211_v45 = vpop.permute.xlu1 %210  ;;  %v437_v46 = vsel %vm415_vm3, %v3620_v43, -inf }
 0x1ef   :  { %v344_v49 = vadd.f32 %v314_v36, %v211_v45  ;;  %438 = vmax.xlane.f32.xlu1 %v437_v46  ;;  %v391_v51 = vsel %vm359_vm10, %v343_v41, %v375_v44  ;;  %v3653_v41 = vadd.f32 %v397_v35, %v3571_v40 }
 0x1f0   :  { %v3625_v52 = vadd.f32 %v391_v51, %v3571_v40 }
 0x1f1   :  { %v376_v54 = vmul.f32 0.2, %v344_v49  ;;  %vm360_vm11 = vcmp.ge.f32.partialorder %v344_v49, 0.0 }
 0x1f2   :  { %v218_v56 = vpop.permute.xlu1 %217  ;;  %v440_v58 = vsel %vm415_vm3, %v3625_v52, -inf }
 0x1f3   :  { %v345_v60 = vadd.f32 %v318_v55, %v218_v56  ;;  %441 = vmax.xlane.f32.xlu0 %v440_v58  ;;  %v392_v61 = vsel %vm360_vm11, %v344_v49, %v376_v54  ;;  %v458_v49 = vsel %vm415_vm3, %v3653_v41, -inf }
 0x1f4   :  { %v3632_v63 = vadd.f32 %v392_v61, %v3579_v50 }
 0x1f5   :  { %v377_v0 = vmul.f32 0.2, %v345_v60  ;;  %vm361_vm12 = vcmp.ge.f32.partialorder %v345_v60, 0.0 }
 0x1f6   :  { %v222_v3 = vpop.permute.xlu1 %221  ;;  %v443_v4 = vsel %vm415_vm3, %v3632_v63, -inf }
 0x1f7   :  { %v346_v9 = vadd.f32 %v318_v55, %v222_v3  ;;  %444 = vmax.xlane.f32.xlu1 %v443_v4  ;;  %v393_v10 = vsel %vm361_vm12, %v345_v60, %v377_v0 }
 0x1f8   :  { %v3637_v11 = vadd.f32 %v393_v10, %v3571_v40 }
 0x1f9   :  { %v378_v15 = vmul.f32 0.2, %v346_v9  ;;  %vm362_vm13 = vcmp.ge.f32.partialorder %v346_v9, 0.0 }
 0x1fa   :  { %v229_v19 = vpop.permute.xlu1 %228  ;;  %v446_v21 = vsel %vm415_vm3, %v3637_v11, -inf }
 0x1fb   :  { %v347_v24 = vadd.f32 %v322_v17, %v229_v19  ;;  %447 = vmax.xlane.f32.xlu0 %v446_v21  ;;  %v394_v26 = vsel %vm362_vm13, %v346_v9, %v378_v15 }
 0x1fc   :  { %v3643_v27 = vadd.f32 %v394_v26, %v3579_v50 }
 0x1fd   :  { %v379_v29 = vmul.f32 0.2, %v347_v24  ;;  %vm363_vm15 = vcmp.ge.f32.partialorder %v347_v24, 0.0 }
 0x1fe   :  { %v233_v30 = vpop.permute.xlu1 %232  ;;  %v449_v31 = vsel %vm415_vm3, %v3643_v27, -inf }
 0x1ff   :  { %v348_v32 = vadd.f32 %v322_v17, %v233_v30  ;;  %450 = vmax.xlane.f32.xlu1 %v449_v31  ;;  %v395_v33 = vsel %vm363_vm15, %v347_v24, %v379_v29 }
 0x200   :  { %v3648_v36 = vadd.f32 %v395_v33, %v3571_v40 }
 0x201   :  { %vm364_vm1 = vcmp.ge.f32.partialorder %v348_v32, 0.0  ;;  %v380_v37 = vmul.f32 0.2, %v348_v32 }
 0x202   :  { %v244_v38 = vpop.permute.xlu1 %243  ;;  %v452_v39 = vsel %vm415_vm3, %v3648_v36, -inf }
 0x203   :  { %v350_v42 = vadd.f32 %v326_v59, %v244_v38  ;;  %453 = vmax.xlane.f32.xlu0 %v452_v39  ;;  %v396_v44 = vsel %vm364_vm1, %v348_v32, %v380_v37 }
 0x204   :  { %v3656_v45 = vadd.f32 %v396_v44, %v3579_v50 }
 0x205   :  { %vm366_vm2 = vcmp.ge.f32.partialorder %v350_v42, 0.0  ;;  %v382_v46 = vmul.f32 0.2, %v350_v42 }
 0x206   :  { %v455_v47 = vsel %vm415_vm3, %v3656_v45, -inf }
 0x207   :  { %456 = vmax.xlane.f32.xlu1 %v455_v47  ;;  %459 = vmax.xlane.f32.xlu0 %v458_v49  ;;  %v398_v51 = vsel %vm366_vm2, %v350_v42, %v382_v46 }
 0x208   :  { %v3663_v40 = vadd.f32 %v398_v51, %v3579_v50 }
 0x20a   :  { %v461_v54 = vsel %vm415_vm3, %v3663_v40, -inf }
 0x20b   :  { %462 = vmax.xlane.f32.xlu1 %v461_v54 }
 0x264   :  { %v418_v55 = vpop.xlane.xlu0 %417 }
 0x265   :  { %v464_v56 = vsub.f32 %v3574_v48, %v418_v55 }
 0x267   :  { %v480_v58 = vmul.f32 1.442695, %v464_v56  ;;  %v3708_v56 = vpop.f32.mrb[0].mxu1 }
 0x268   :  { %v421_v59 = vpop.xlane.xlu1 %420  ;;  %v424_v60 = vpop.xlane.xlu0 %423 }
 0x269   :  { %3326 = vpow2.f32 %v480_v58  ;;  %v465_v61 = vsub.f32 %v3588_v57, %v421_v59  ;;  %v466_v62 = vsub.f32 %v3584_v53, %v424_v60  ;;  %v3712_v59 = vpop.f32.mrb[1].mxu1  ;;  %v2917_v60 = vld [vmem:[%s4219_s4] ss:$0 sm:$0xff] }
 0x26b   :  { %v482_v0 = vmul.f32 1.442695, %v465_v61  ;;  %v484_v2 = vmul.f32 1.442695, %v466_v62  ;;  %v725_v62 = vmul.f32 %v3708_v56, %v2917_v60 }
 0x26c   :  { %v427_v3 = vpop.xlane.xlu0 %426 }
 0x26d   :  { %3328 = vpow2.f32 %v482_v0  ;;  %v467_v50 = vsub.f32 %v3595_v1, %v427_v3 }
 0x26e   :  { %3330 = vpow2.f32 %v484_v2 }
 0x26f   :  { %v486_v4 = vmul.f32 1.442695, %v467_v50 }
 0x270   :  { %v430_v5 = vpop.xlane.xlu0 %429 }
 0x271   :  { %3332 = vpow2.f32 %v486_v4  ;;  %v468_v48 = vsub.f32 %v3601_v13, %v430_v5  ;;  %v2918_v5 = vld [vmem:[%s4219_s4 + $0x1] ss:$0 sm:$0xff] }
 0x273   :  { %v3672_v9 = vpop.eup %3326  ;;  %v488_v10 = vmul.f32 1.442695, %v468_v48  ;;  %v726_v48 = vmul.f32 %v2918_v5, %v3712_v59 }
 0x274   :  { %v433_v15 = vpop.xlane.xlu1 %432  ;;  %v512_v57 = vsel %vm415_vm3, %v3672_v9, 0.0 }
 0x275   :  { %3334 = vpow2.f32 %v488_v10  ;;  %v469_v53 = vsub.f32 %v3607_v25, %v433_v15  ;;  %513 = vadd.xlane.f32.xlu0 %v512_v57  ;;  %v727_v10 = vmul.f32 %v3708_v56, %v2918_v5 }
 0x277   :  { %v3677_v17 = vpop.eup %3328  ;;  %v490_v1 = vmul.f32 1.442695, %v469_v53  ;;  %v3232_v53 = vpack.c.bf16 %v727_v10, %v726_v48 }
 0x278   :  { %v3679_v19 = vpop.eup %3330  ;;  %v436_v21 = vpop.xlane.xlu0 %435  ;;  %v515_v13 = vsel %vm415_vm3, %v3677_v17, 0.0 }
 0x279   :  { %3336 = vpow2.f32 %v490_v1  ;;  %v470_v23 = vsub.f32 %v3613_v34, %v436_v21  ;;  %516 = vadd.xlane.f32.xlu1 %v515_v13  ;;  %v518_v24 = vsel %vm415_vm3, %v3679_v19, 0.0  ;;  %3233 = vmatprep.subr.bf16.mxu1 %v3232_v53 }
 0x27a   :  { %519 = vadd.xlane.f32.xlu0 %v518_v24  ;;  %3235 = vmatpush3.bf16.msra.mxu1 %v3232_v53 }
 0x27b   :  { %v3686_v26 = vpop.eup %3332  ;;  %v492_v25 = vmul.f32 1.442695, %v470_v23 }
 0x27c   :  { %v439_v29 = vpop.xlane.xlu1 %438  ;;  %v521_v30 = vsel %vm415_vm3, %v3686_v26, 0.0 }
 0x27d   :  { %3338 = vpow2.f32 %v492_v25  ;;  %v471_v31 = vsub.f32 %v3620_v43, %v439_v29  ;;  %522 = vadd.xlane.f32.xlu1 %v521_v30 }
 0x27f   :  { %v3691_v32 = vpop.eup %3334  ;;  %v494_v33 = vmul.f32 1.442695, %v471_v31 }
 0x280   :  { %v442_v34 = vpop.xlane.xlu0 %441  ;;  %v524_v35 = vsel %vm415_vm3, %v3691_v32, 0.0 }
 0x281   :  { %3340 = vpow2.f32 %v494_v33  ;;  %v472_v37 = vsub.f32 %v3625_v52, %v442_v34  ;;  %525 = vadd.xlane.f32.xlu0 %v524_v35  ;;  %v2919_v33 = vld [vmem:[%s4219_s4 + $0x2] ss:$0 sm:$0xff] }
 0x282   :  { %v729_v34 = vmul.f32 %v3708_v56, %v2919_v33 }
 0x283   :  { %v3696_v38 = vpop.eup %3336  ;;  %v496_v39 = vmul.f32 1.442695, %v472_v37 }
 0x284   :  { %v445_v42 = vpop.xlane.xlu1 %444  ;;  %v527_v44 = vsel %vm415_vm3, %v3696_v38, 0.0 }
 0x285   :  { %3342 = vpow2.f32 %v496_v39  ;;  %v473_v43 = vsub.f32 %v3632_v63, %v445_v42  ;;  %528 = vadd.xlane.f32.xlu1 %v527_v44 }
 0x287   :  { %v3701_v46 = vpop.eup %3338  ;;  %v498_v47 = vmul.f32 1.442695, %v473_v43  ;;  %v2920_v43 = vld [vmem:[%s4219_s4 + $0x3] ss:$0 sm:$0xff] }
 0x288   :  { %v448_v49 = vpop.xlane.xlu0 %447  ;;  %v530_v51 = vsel %vm415_vm3, %v3701_v46, 0.0 }
 0x289   :  { %3344 = vpow2.f32 %v498_v47  ;;  %v474_v52 = vsub.f32 %v3637_v11, %v448_v49  ;;  %531 = vadd.xlane.f32.xlu0 %v530_v51  ;;  %v724_v11 = vmul.f32 %v2917_v60, %v3712_v59  ;;  %v730_v47 = vmul.f32 %v2920_v43, %v3712_v59 }
 0x28a   :  { %v731_v49 = vmul.f32 %v3708_v56, %v2920_v43 }
 0x28b   :  { %v3706_v54 = vpop.eup %3340  ;;  %v500_v55 = vmul.f32 1.442695, %v474_v52  ;;  %v3228_v3 = vpack.c.bf16 %v725_v62, %v724_v11  ;;  %v2921_v11 = vld [vmem:[%s4219_s4 + $0x4] ss:$0 sm:$0xff] }
 0x28c   :  { %v451_v58 = vpop.xlane.xlu1 %450  ;;  %v533_v63 = vsel %vm415_vm3, %v3706_v54, 0.0  ;;  %v3240_v52 = vpack.c.bf16 %v731_v49, %v730_v47  ;;  %v732_v62 = vmul.f32 %v2921_v11, %v3712_v59 }
 0x28d   :  { %3346 = vpow2.f32 %v500_v55  ;;  %v475_v61 = vsub.f32 %v3643_v27, %v451_v58  ;;  %534 = vadd.xlane.f32.xlu1 %v533_v63  ;;  %3229 = vmatprep.subr.bf16.mxu0 %v3228_v3 }
 0x28e   :  { %3231 = vmatpush3.bf16.msra.mxu0 %v3228_v3  ;;  %3241 = vmatprep.subr.bf16.mxu1 %v3240_v52 }
 0x28f   :  { %v3720_v0 = vpop.eup %3342  ;;  %v502_v2 = vmul.f32 1.442695, %v475_v61 }
 0x290   :  { %v454_v50 = vpop.xlane.xlu0 %453  ;;  %v536_v4 = vsel %vm415_vm3, %v3720_v0, 0.0 }
 0x291   :  { %3348 = vpow2.f32 %v502_v2  ;;  %v476_v27 = vsub.f32 %v3648_v36, %v454_v50  ;;  %537 = vadd.xlane.f32.xlu0 %v536_v4  ;;  %v733_v2 = vmul.f32 %v3708_v56, %v2921_v11  ;;  %v2922_v50 = vld [vmem:[%s4219_s4 + $0x5] ss:$0 sm:$0xff] }
 0x292   :  { %v734_v4 = vmul.f32 %v2922_v50, %v3712_v59  ;;  %v735_v5 = vmul.f32 %v3708_v56, %v2922_v50 }
 0x293   :  { %v3730_v15 = vpop.eup %3344  ;;  %v504_v57 = vmul.f32 1.442695, %v476_v27  ;;  %v3244_v3 = vpack.c.bf16 %v733_v2, %v732_v62  ;;  %v2923_v27 = vld [vmem:[%s4219_s4 + $0x6] ss:$0 sm:$0xff] }
 0x294   :  { %v457_v1 = vpop.xlane.xlu1 %456  ;;  %v460_v21 = vpop.xlane.xlu0 %459  ;;  %v539_v13 = vsel %vm415_vm3, %v3730_v15, 0.0  ;;  %v736_v48 = vmul.f32 %v2923_v27, %v3712_v59  ;;  %v737_v10 = vmul.f32 %v3708_v56, %v2923_v27  ;;  %v3248_v53 = vpack.c.bf16 %v735_v5, %v734_v4 }
 0x295   :  { %3350 = vpow2.f32 %v504_v57  ;;  %v477_v23 = vsub.f32 %v3656_v45, %v457_v1  ;;  %v478_v36 = vsub.f32 %v3653_v41, %v460_v21  ;;  %540 = vadd.xlane.f32.xlu1 %v539_v13  ;;  %v728_v41 = vmul.f32 %v2919_v33, %v3712_v59  ;;  %v2924_v57 = vld [vmem:[%s4219_s4 + $0x7] ss:$0 sm:$0xff] }
 0x296   :  { %v738_v1 = vmul.f32 %v2924_v57, %v3712_v59  ;;  %v739_v21 = vmul.f32 %v3708_v56, %v2924_v57  ;;  %v3791_v13 = vpack.c.bf16 %v737_v10, %v736_v48 }
 0x297   :  { %v3736_v24 = vpop.eup %3346  ;;  %v506_v25 = vmul.f32 1.442695, %v477_v23  ;;  %v508_v29 = vmul.f32 1.442695, %v478_v36  ;;  %v3236_v39 = vpack.c.bf16 %v729_v34, %v728_v41 }
 0x298   :  { %v463_v30 = vpop.xlane.xlu1 %462  ;;  %v542_v31 = vsel %vm415_vm3, %v3736_v24, 0.0  ;;  %v3793_v23 = vpack.c.bf16 %v739_v21, %v738_v1 }
 0x299   :  { %3352 = vpow2.f32 %v506_v25  ;;  %v479_v45 = vsub.f32 %v3663_v40, %v463_v30  ;;  %543 = vadd.xlane.f32.xlu0 %v542_v31  ;;  %3237 = vmatprep.subr.bf16.mxu0 %v3236_v39 }
 0x29a   :  { %3354 = vpow2.f32 %v508_v29 }
 0x29b   :  { %v3746_v35 = vpop.eup %3348  ;;  %v510_v37 = vmul.f32 1.442695, %v479_v45 }
 0x29c   :  { %v545_v42 = vsel %vm415_vm3, %v3746_v35, 0.0 }
 0x29d   :  { %3356 = vpow2.f32 %v510_v37  ;;  %546 = vadd.xlane.f32.xlu1 %v545_v42 }
 0x29f   :  { %v3750_v44 = vpop.eup %3350 }
 0x2a0   :  { %v548_v40 = vsel %vm415_vm3, %v3750_v44, 0.0 }
 0x2a1   :  { %549 = vadd.xlane.f32.xlu0 %v548_v40 }
 0x2a3   :  { %v3759_v51 = vpop.eup %3352 }
 0x2a4   :  { %v3761_v55 = vpop.eup %3354  ;;  %v551_v58 = vsel %vm415_vm3, %v3759_v51, 0.0 }
 0x2a5   :  { %552 = vadd.xlane.f32.xlu1 %v551_v58  ;;  %v554_v63 = vsel %vm415_vm3, %v3761_v55, 0.0 }
 0x2a6   :  { %555 = vadd.xlane.f32.xlu0 %v554_v63 }
 0x2a7   :  { %v3767_v60 = vpop.eup %3356 }
 0x2a8   :  { %v557_v61 = vsel %vm415_vm3, %v3767_v60, 0.0 }
 0x2a9   :  { %558 = vadd.xlane.f32.xlu1 %v557_v61 }
 0x302   :  { %v514_v36 = vpop.xlane.xlu0 %513 }
 0x303   :  { %3358 = vrcp.f32 %v514_v36  ;;  %v1981_v36 = vld [vmem:[%s4221_s6] sm:$0xff] }
 0x306   :  { %v517_v25 = vpop.xlane.xlu1 %516 }
 0x307   :  { %3360 = vrcp.f32 %v517_v25  ;;  %v520_v29 = vpop.xlane.xlu0 %519  ;;  %v1982_v25 = vld [vmem:[%s4221_s6 + $0x8] sm:$0xff] }
 0x308   :  { %3362 = vrcp.f32 %v520_v29  ;;  %v3268_v29 = vpack.c.bf16 %v1982_v25, %v1981_v36 }
 0x30a   :  { %v523_v30 = vpop.xlane.xlu1 %522 }
 0x30b   :  { %3364 = vrcp.f32 %v523_v30 }
 0x30d   :  { %v3359_v31 = vpop.eup %3358 }
 0x30e   :  { %v526_v33 = vpop.xlane.xlu0 %525  ;;  %v576_v45 = vmul.f32 %v3359_v31, %v3672_v9 }
 0x30f   :  { %3366 = vrcp.f32 %v526_v33 }
 0x310   :  { %3079 = vmatprep.mubr.msk.f32.mxu0 %vm415_vm3, %v576_v45 }
 0x311   :  { %v3361_v56 = vpop.eup %3360 }
 0x312   :  { %v3363_v59 = vpop.eup %3362  ;;  %v577_v41 = vmul.f32 %v3361_v56, %v3677_v17  ;;  %v529_v34 = vpop.xlane.xlu1 %528 }
 0x313   :  { %3368 = vrcp.f32 %v529_v34  ;;  %v578_v37 = vmul.f32 %v3363_v59, %v3679_v19 }
 0x314   :  { %3080 = vmatmul.mubr.msk.f32.vlgmr.msra.gmra.mrb[2].mxu0 %vm415_vm3, %v577_v41 }
 0x315   :  { %v3365_v42 = vpop.eup %3364  ;;  %3086 = vmatprep.mubr.msk.f32.mxu1 %vm415_vm3, %v578_v37  ;;  %3239 = vmatpush3.bf16.msra.mxu0 %v3236_v39 }
 0x316   :  { %v579_v40 = vmul.f32 %v3365_v42, %v3686_v26  ;;  %v532_v9 = vpop.xlane.xlu0 %531  ;;  %3245 = vmatprep.subr.bf16.mxu0 %v3244_v3 }
 0x317   :  { %3370 = vrcp.f32 %v532_v9 }
 0x318   :  { %3087 = vmatmul.mubr.msk.f32.vlgmr.msra.gmra.mrb[2].mxu1 %vm415_vm3, %v579_v40 }
 0x319   :  { %v3367_v43 = vpop.eup %3366  ;;  %3243 = vmatpush3.bf16.msra.mxu1 %v3240_v52 }
 0x31a   :  { %v535_v17 = vpop.xlane.xlu1 %534  ;;  %v580_v47 = vmul.f32 %v3367_v43, %v3691_v32  ;;  %3249 = vmatprep.subr.bf16.mxu1 %v3248_v53 }
 0x31b   :  { %3372 = vrcp.f32 %v535_v17 }
 0x31c   :  { %3093 = vmatprep.mubr.msk.f32.mxu0 %vm415_vm3, %v580_v47 }
 0x31d   :  { %v3369_v19 = vpop.eup %3368 }
 0x31e   :  { %v581_v49 = vmul.f32 %v3369_v19, %v3696_v38  ;;  %v538_v39 = vpop.xlane.xlu0 %537 }
 0x31f   :  { %3374 = vrcp.f32 %v538_v39 }
 0x320   :  { %3094 = vmatmul.mubr.msk.f32.vlgmr.msra.gmra.mrb[4].mxu0 %vm415_vm3, %v581_v49 }
 0x321   :  { %v3371_v26 = vpop.eup %3370  ;;  %3247 = vmatpush3.bf16.msra.mxu0 %v3244_v3 }
 0x322   :  { %v541_v58 = vpop.xlane.xlu1 %540  ;;  %v582_v63 = vmul.f32 %v3371_v26, %v3701_v46  ;;  %3253 = vmatprep.subr.bf16.mxu0 %v3791_v13 }
 0x323   :  { %3376 = vrcp.f32 %v541_v58 }
 0x324   :  { %3100 = vmatprep.mubr.msk.f32.mxu1 %vm415_vm3, %v582_v63 }
 0x325   :  { %v3373_v32 = vpop.eup %3372 }
 0x326   :  { %v583_v52 = vmul.f32 %v3373_v32, %v3706_v54  ;;  %v544_v61 = vpop.xlane.xlu0 %543 }
 0x327   :  { %3378 = vrcp.f32 %v544_v61 }
 0x328   :  { %3101 = vmatmul.mubr.msk.f32.vlgmr.msra.gmra.mrb[4].mxu1 %vm415_vm3, %v583_v52 }
 0x329   :  { %v3375_v38 = vpop.eup %3374  ;;  %3251 = vmatpush3.bf16.msra.mxu1 %v3248_v53 }
 0x32a   :  { %v547_v11 = vpop.xlane.xlu1 %546  ;;  %v584_v62 = vmul.f32 %v3375_v38, %v3720_v0  ;;  %3257 = vmatprep.subr.bf16.mxu1 %v3793_v23 }
 0x32b   :  { %3380 = vrcp.f32 %v547_v11 }
 0x32c   :  { %3107 = vmatprep.mubr.msk.f32.mxu0 %vm415_vm3, %v584_v62 }
 0x32d   :  { %v3377_v46 = vpop.eup %3376 }
 0x32e   :  { %v585_v2 = vmul.f32 %v3377_v46, %v3730_v15  ;;  %v550_v3 = vpop.xlane.xlu0 %549 }
 0x32f   :  { %3382 = vrcp.f32 %v550_v3 }
 0x330   :  { %3108 = vmatmul.mubr.msk.f32.vlgmr.msra.gmra.mrb[6].mxu0 %vm415_vm3, %v585_v2 }
 0x331   :  { %v3379_v54 = vpop.eup %3378  ;;  %3255 = vmatpush3.bf16.msra.mxu0 %v3791_v13  ;;  %v1431_v13 = vld [vmem:[%s4220_s7 + $0x8] sm:$0xff] }
 0x332   :  { %v553_v50 = vpop.xlane.xlu1 %552  ;;  %v586_v4 = vmul.f32 %v3379_v54, %v3736_v24 }
 0x333   :  { %3384 = vrcp.f32 %v553_v50  ;;  %v556_v0 = vpop.xlane.xlu0 %555 }
 0x334   :  { %3386 = vrcp.f32 %v556_v0  ;;  %3114 = vmatprep.mubr.msk.f32.mxu1 %vm415_vm3, %v586_v4 }
 0x335   :  { %v3381_v5 = vpop.eup %3380 }
 0x336   :  { %v587_v27 = vmul.f32 %v3381_v5, %v3746_v35  ;;  %v559_v48 = vpop.xlane.xlu1 %558 }
 0x337   :  { %3388 = vrcp.f32 %v559_v48 }
 0x338   :  { %3115 = vmatmul.mubr.msk.f32.vlgmr.msra.gmra.mrb[6].mxu1 %vm415_vm3, %v587_v27 }
 0x339   :  { %v3383_v15 = vpop.eup %3382  ;;  %3259 = vmatpush3.bf16.msra.mxu1 %v3793_v23 }
 0x33a   :  { %v588_v10 = vmul.f32 %v3383_v15, %v3750_v44  ;;  %v1430_v44 = vld [vmem:[%s4220_s7] sm:$0xff] }
 0x33c   :  { %3121 = vmatprep.mubr.msk.f32.mxu0 %vm415_vm3, %v588_v10 }
 0x33d   :  { %v3385_v24 = vpop.eup %3384 }
 0x33e   :  { %v3387_v57 = vpop.eup %3386  ;;  %v589_v53 = vmul.f32 %v3385_v24, %v3759_v51  ;;  %v3260_v51 = vpack.c.bf16 %v1431_v13, %v1430_v44 }
 0x33f   :  { %v590_v1 = vmul.f32 %v3387_v57, %v3761_v55  ;;  %v1432_v55 = vld [vmem:[%s4220_s7 + $0x10] sm:$0xff] }
 0x340   :  { %3122 = vmatmul.mubr.msk.f32.vlgmr.msra.gmra.mrb[8].mxu0 %vm415_vm3, %v589_v53  ;;  %3261 = vmatprep.subr.bf16.mxu1 %v3260_v51 }
 0x341   :  { %v3389_v35 = vpop.eup %3388  ;;  %3128 = vmatprep.mubr.msk.f32.mxu1 %vm415_vm3, %v590_v1  ;;  %v2941_v1 = vld [vmem:[%s4222_s5] ss:$0 sm:$0xff] }
 0x342   :  { %v591_v21 = vmul.f32 %v3389_v35, %v3767_v60  ;;  %v1433_v60 = vld [vmem:[%s4220_s7 + $0x18] sm:$0xff] }
 0x343   :  { %v3264_v23 = vpack.c.bf16 %v1433_v60, %v1432_v55  ;;  %v1983_v60 = vld [vmem:[%s4221_s6 + $0x10] sm:$0xff] }
 0x344   :  { %3129 = vmatmul.mubr.msk.f32.vlgmr.msra.gmra.mrb[8].mxu1 %vm415_vm3, %v591_v21 }
 0x345   :  { %3263 = vmatpush3.bf16.msra.mxu1 %v3260_v51 }
 0x346   :  { %3265 = vmatprep.subr.bf16.mxu1 %v3264_v23 }
 0x349   :  { %3267 = vmatpush3.bf16.msra.mxu1 %v3264_v23  ;;  %v1984_v23 = vld [vmem:[%s4221_s6 + $0x18] sm:$0xff] }
 0x34a   :  { %3269 = vmatprep.subr.bf16.mxu1 %v3268_v29 }
 0x3e7   :  { %v3081_v30 = vpop.f32.mrb[2].mxu0 }
 0x3e8   :  { %v812_v31 = vpop.f32.mrb[3].mxu0  ;;  %v1404_v45 = vsel %vm1388_vm4, %v3081_v30, 0.0  ;;  %v3272_v30 = vpack.c.bf16 %v1984_v23, %v1983_v60  ;;  %v3939_v23 = vld [vmem:[%s4218_s1] sm:$0xff] }
 0x3e9   :  { %v1389_v41 = vsel %vm1388_vm4, %v812_v31, 0.0 }
 0x3eb   :  { %v3088_v33 = vpop.f32.mrb[2].mxu1 }
 0x3ec   :  { %v1405_v56 = vsel %vm1388_vm4, %v3088_v33, 0.0  ;;  %v893_v59 = vpop.f32.mrb[3].mxu1 }
 0x3ed   :  { %v1406_v34 = vadd.f32 %v1405_v56, %v1404_v45  ;;  %v1390_v37 = vsel %vm1388_vm4, %v893_v59, 0.0  ;;  %v2946_v45 = vld [vmem:[%s4223_s8] ss:$0 sm:$0xff]  ;;  %v2947_v56 = vld [vmem:[%s4223_s8 + $0x1] ss:$0 sm:$0xff] }
 0x3ee   :  { %v1391_v42 = vadd.f32 %v1390_v37, %v1389_v41  ;;  %v2949_v59 = vld [vmem:[%s4223_s8 + $0x3] ss:$0 sm:$0xff]  ;;  %v2951_v37 = vld [vmem:[%s4223_s8 + $0x5] ss:$0 sm:$0xff] }
 0x3f3   :  { %v3095_v40 = vpop.f32.mrb[4].mxu0 }
 0x3f4   :  { %v1407_v9 = vsel %vm1388_vm4, %v3095_v40, 0.0  ;;  %v974_v43 = vpop.f32.mrb[5].mxu0 }
 0x3f5   :  { %v1408_v17 = vadd.f32 %v1407_v9, %v1406_v34  ;;  %v1392_v47 = vsel %vm1388_vm4, %v974_v43, 0.0  ;;  %v2950_v34 = vld [vmem:[%s4223_s8 + $0x4] ss:$0 sm:$0xff] }
 0x3f6   :  { %v1393_v19 = vadd.f32 %v1392_v47, %v1391_v42 }
 0x3fb   :  { %v3102_v49 = vpop.f32.mrb[4].mxu1 }
 0x3fc   :  { %v1409_v39 = vsel %vm1388_vm4, %v3102_v49, 0.0  ;;  %v1055_v26 = vpop.f32.mrb[5].mxu1 }
 0x3fd   :  { %v1410_v58 = vadd.f32 %v1409_v39, %v1408_v17  ;;  %v1394_v63 = vsel %vm1388_vm4, %v1055_v26, 0.0  ;;  %v2952_v26 = vld [vmem:[%s4223_s8 + $0x6] ss:$0 sm:$0xff] }
 0x3fe   :  { %v1395_v32 = vadd.f32 %v1394_v63, %v1393_v19 }
 0x403   :  { %v3109_v52 = vpop.f32.mrb[6].mxu0 }
 0x404   :  { %v1411_v61 = vsel %vm1388_vm4, %v3109_v52, 0.0  ;;  %v1136_v38 = vpop.f32.mrb[7].mxu0 }
 0x405   :  { %v1412_v11 = vadd.f32 %v1411_v61, %v1410_v58  ;;  %v1396_v62 = vsel %vm1388_vm4, %v1136_v38, 0.0  ;;  %v2953_v61 = vld [vmem:[%s4223_s8 + $0x7] ss:$0 sm:$0xff] }
 0x406   :  { %v1397_v46 = vadd.f32 %v1396_v62, %v1395_v32 }
 0x40b   :  { %v3116_v2 = vpop.f32.mrb[6].mxu1 }
 0x40c   :  { %v1413_v3 = vsel %vm1388_vm4, %v3116_v2, 0.0  ;;  %v1217_v54 = vpop.f32.mrb[7].mxu1 }
 0x40d   :  { %v1414_v50 = vadd.f32 %v1413_v3, %v1412_v11  ;;  %v1398_v4 = vsel %vm1388_vm4, %v1217_v54, 0.0 }
 0x40e   :  { %v1399_v0 = vadd.f32 %v1398_v4, %v1397_v46 }
 0x413   :  { %v3123_v5 = vpop.f32.mrb[8].mxu0 }
 0x414   :  { %v1415_v27 = vsel %vm1388_vm4, %v3123_v5, 0.0  ;;  %v1298_v48 = vpop.f32.mrb[9].mxu0 }
 0x415   :  { %v1416_v15 = vadd.f32 %v1415_v27, %v1414_v50  ;;  %v1400_v10 = vsel %vm1388_vm4, %v1298_v48, 0.0 }
 0x416   :  { %v1401_v24 = vadd.f32 %v1400_v10, %v1399_v0 }
 0x417   :  { %v3130_v57 = vpop.f32.mrb[8].mxu1 }
 0x418   :  { %v1417_v53 = vsel %vm1388_vm4, %v3130_v57, 0.0  ;;  %v1379_v35 = vpop.f32.mrb[9].mxu1 }
 0x419   :  { %v1418_v21 = vadd.f32 %v1417_v53, %v1416_v15  ;;  %v1402_v44 = vsel %vm1388_vm4, %v1379_v35, 0.0 }
 0x41a   :  { %v1403_v13 = vadd.f32 %v1402_v44, %v1401_v24 }
 0x41b   :  { %v1427_v51 = vadd.f32 %v2941_v1, %v1418_v21 }
 0x41c   :  { %v1426_v55 = vadd.f32 %v2941_v1, %v1403_v13 }
 0x41d   :  { %v1429_v25 = vmax.f32 %v1427_v51, 0.0 }
 0x41e   :  { %v1428_v36 = vmax.f32 %v1426_v55, 0.0 }
 0x420   :  { %3139 = vmatprep.mubr.msk.f32.mxu1 %vm1388_vm4, %v1428_v36 }
 0x421   :  { %3140 = vmatmul.mubr.msk.f32.vlgmr.msra.gmra.mrb[10].mxu1 %vm1388_vm4, %v1429_v25 }
 0x422   :  { %3271 = vmatpush3.bf16.msra.mxu1 %v3268_v29  ;;  %3150 = vmatprep.mubr.msk.f32.mxu1 %vm1388_vm4, %v1428_v36  ;;  %v2948_v29 = vld [vmem:[%s4223_s8 + $0x2] ss:$0 sm:$0xff] }
 0x423   :  { %3273 = vmatprep.subr.bf16.mxu1 %v3272_v30 }
 0x426   :  { %3275 = vmatpush3.bf16.msra.mxu1 %v3272_v30 }
 0x429   :  { %3151 = vmatmul.mubr.msk.f32.vlgmr.msra.gmra.mrb[12].mxu1 %vm1388_vm4, %v1429_v25 }
 0x4f4   :  { %v3141_v31 = vpop.f32.mrb[10].mxu1 }
 0x4f5   :  { %v1506_v33 = vpop.f32.mrb[11].mxu1 }
 0x4f6   :  { %1515 = vxpose.xlu0.b32.start [1/2] (short) (narrow) %v1506_v33, 16 }
 0x4fa   :  { %1516 = vxpose.xlu0.b32.end [2/2] (short) (narrow) %v3141_v31, 16 }
 0x4fc   :  { %v3152_v41 = vpop.f32.mrb[12].mxu1 }
 0x4fd   :  { %v2051_v42 = vpop.f32.mrb[13].mxu1  ;;  %v2117_v40 = vmul.f32 %v3152_v41, %v2946_v45  ;;  %v2119_v9 = vmul.f32 %v3152_v41, %v2947_v56  ;;  %v2121_v43 = vmul.f32 %v3152_v41, %v2948_v29  ;;  %v2123_v17 = vmul.f32 %v3152_v41, %v2949_v59 }
 0x4fe   :  { %v2116_v47 = vmul.f32 %v2946_v45, %v2051_v42  ;;  %v2118_v19 = vmul.f32 %v2947_v56, %v2051_v42  ;;  %v2120_v49 = vmul.f32 %v2948_v29, %v2051_v42  ;;  %v2122_v39 = vmul.f32 %v2949_v59, %v2051_v42  ;;  %v3949_v59 = vld [vmem:[%s4218_s1 + $0x8] sm:$0xff] }
 0x4ff   :  { %v2124_v58 = vmul.f32 %v2950_v34, %v2051_v42  ;;  %v2125_v63 = vmul.f32 %v3152_v41, %v2950_v34  ;;  %v2126_v32 = vmul.f32 %v2951_v37, %v2051_v42  ;;  %v2127_v52 = vmul.f32 %v3152_v41, %v2951_v37 }
 0x500   :  { %v3276_v38 = vpack.c.bf16 %v2117_v40, %v2116_v47  ;;  %v3280_v11 = vpack.c.bf16 %v2119_v9, %v2118_v19  ;;  %v3902_v62 = vpack.c.bf16 %v2121_v43, %v2120_v49  ;;  %v3904_v46 = vpack.c.bf16 %v2123_v17, %v2122_v39 }
 0x501   :  { %v3906_v2 = vpack.c.bf16 %v2125_v63, %v2124_v58  ;;  %v3908_v3 = vpack.c.bf16 %v2127_v52, %v2126_v32  ;;  %v2128_v54 = vmul.f32 %v2952_v26, %v2051_v42  ;;  %v2129_v50 = vmul.f32 %v3152_v41, %v2952_v26 }
 0x502   :  { %3277 = vmatprep.subr.bf16.mxu0 %v3276_v38  ;;  %3281 = vmatprep.subr.bf16.mxu1 %v3280_v11  ;;  %v2130_v4 = vmul.f32 %v2953_v61, %v2051_v42  ;;  %v2131_v0 = vmul.f32 %v3152_v41, %v2953_v61 }
 0x503   :  { %3279 = vmatpush3.bf16.msra.mxu0 %v3276_v38  ;;  %3283 = vmatpush3.bf16.msra.mxu1 %v3280_v11  ;;  %v3910_v5 = vpack.c.bf16 %v2129_v50, %v2128_v54 }
 0x504   :  { %3285 = vmatprep.subr.bf16.mxu0 %v3902_v62  ;;  %3289 = vmatprep.subr.bf16.mxu1 %v3904_v46  ;;  %v3914_v27 = vpack.c.bf16 %v2131_v0, %v2130_v4 }
 0x576   :  { %v1531_v48 = vpop.trf.xlu0 }
 0x577   :  { %v1594_v15 = vrot.slane %v1531_v48, %v203_v18  ;;  %v1550_v10 = vrot.slane %v1531_v48, %v3532_v7  ;;  %v1561_v24 = vrot.slane %v1531_v48, %v170_v8  ;;  %v1572_v57 = vrot.slane %v1531_v48, %v181_v14 }
 0x578   :  { %v1583_v53 = vrot.slane %v1531_v48, %v192_v16  ;;  %v1605_v18 = vrot.slane %v1531_v48, %v214_v20  ;;  %v1616_v8 = vrot.slane %v1531_v48, %v225_v22  ;;  %v1627_v14 = vrot.slane %v1531_v48, %v236_v12 }
 0x579   :  { %1600 = vbcast.lane.b32.xlu0 %v1594_v15, 264  ;;  %1552 = vbcast.lane.b32.xlu1 %v1550_v10, 256 }
 0x57a   :  { %v1532_v1 = vpop.trf.xlu0 }
 0x57b   :  { %v1643_v16 = vrot.slane %v1532_v1, %v3561_v28  ;;  %v1636_v33 = vcombine.high %v1532_v1, %v1532_v1 }
 0x57d   :  { %1556 = vbcast.lane.b32.xlu1 %v1550_v10, 264  ;;  %v1659_v35 = vrot.slane %v1643_v16, %v3561_v28  ;;  %v1651_v21 = vcombine.high %v1643_v16, %v1643_v16  ;;  %v1650_v40 = vrot.slane %v1636_v33, %v3561_v28 }
 0x57f   :  { %v1688_v20 = vrot.slane %v1659_v35, %v3532_v7  ;;  %v1673_v51 = vrot.slane %v1651_v21, %v3561_v28  ;;  %v1681_v29 = vcombine.high %v1659_v35, %v1659_v35  ;;  %v3964_v26 = vrot.slane %v1650_v40, %v3561_v28 }
 0x580   :  { %v1652_v1 = vcombine.high %v1650_v40, %v1650_v40 }
 0x581   :  { %1563 = vbcast.lane.b32.xlu1 %v1561_v24, 256  ;;  %v1692_v6 = vrot.slane %v1673_v51, %v3532_v7  ;;  %v1696_v43 = vrot.slane %v1681_v29, %v3532_v7  ;;  %v1683_v32 = vcombine.high %v1673_v51, %v1673_v51  ;;  %v1704_v54 = vrot.slane %v3964_v26, %v3532_v7 }
 0x583   :  { %v1700_v4 = vrot.slane %v1683_v32, %v3532_v7 }
 0x585   :  { %1567 = vbcast.lane.b32.xlu1 %v1561_v24, 264 }
 0x589   :  { %1574 = vbcast.lane.b32.xlu1 %v1572_v57, 256 }
 0x58d   :  { %1578 = vbcast.lane.b32.xlu1 %v1572_v57, 264 }
 0x591   :  { %1585 = vbcast.lane.b32.xlu1 %v1583_v53, 256 }
 0x595   :  { %1589 = vbcast.lane.b32.xlu1 %v1583_v53, 264 }
 0x599   :  { %1596 = vbcast.lane.b32.xlu1 %v1594_v15, 256 }
 0x59d   :  { %1607 = vbcast.lane.b32.xlu1 %v1605_v18, 256 }
 0x5a1   :  { %1611 = vbcast.lane.b32.xlu1 %v1605_v18, 264 }
 0x5a5   :  { %1618 = vbcast.lane.b32.xlu1 %v1616_v8, 256 }
 0x5a9   :  { %1622 = vbcast.lane.b32.xlu1 %v1616_v8, 264 }
 0x5ad   :  { %1629 = vbcast.lane.b32.xlu1 %v1627_v14, 256 }
 0x5b1   :  { %1633 = vbcast.lane.b32.xlu1 %v1627_v14, 264 }
 0x5eb   :  { %v1553_v44 = vpop.permute.xlu1 %1552  ;;  %v1601_v48 = vpop.permute.xlu0 %1600 }
 0x5ec   :  { %v1725_v13 = vadd.f32 %v1688_v20, %v1553_v44  ;;  %v1734_v53 = vadd.f32 %v1704_v54, %v1601_v48 }
 0x5ee   :  { %vm1741_vm5 = vcmp.ge.f32.partialorder %v1725_v13, 0.0  ;;  %v1757_v22 = vmul.f32 0.2, %v1725_v13  ;;  %vm1750_vm12 = vcmp.ge.f32.partialorder %v1734_v53, 0.0 }
 0x5ef   :  { %v1557_v55 = vpop.permute.xlu1 %1556 }
 0x5f0   :  { %v1726_v60 = vadd.f32 %v1688_v20, %v1557_v55  ;;  %v1773_v12 = vsel %vm1741_vm5, %v1725_v13, %v1757_v22  ;;  %v1766_v20 = vmul.f32 0.2, %v1734_v53  ;;  %v1680_v55 = vrot.slane %v1652_v1, %v3561_v28 }
 0x5f1   :  { %v3942_v36 = vadd.f32 %v3939_v23, %v1773_v12 }
 0x5f2   :  { %vm1742_vm6 = vcmp.ge.f32.partialorder %v1726_v60, 0.0  ;;  %v1758_v25 = vmul.f32 0.2, %v1726_v60 }
 0x5f3   :  { %v1564_v30 = vpop.permute.xlu1 %1563  ;;  %v1805_v31 = vsel %vm415_vm3, %v3942_v36, -inf }
 0x5f4   :  { %v1727_v45 = vadd.f32 %v1692_v6, %v1564_v30  ;;  %1806 = vmax.xlane.f32.xlu1 %v1805_v31  ;;  %v1774_v56 = vsel %vm1742_vm6, %v1726_v60, %v1758_v25  ;;  %v1782_v30 = vsel %vm1750_vm12, %v1734_v53, %v1766_v20 }
 0x5f5   :  { %v3952_v41 = vadd.f32 %v3949_v59, %v1774_v56  ;;  %v3997_v28 = vadd.f32 %v3949_v59, %v1782_v30 }
 0x5f6   :  { %vm1743_vm7 = vcmp.ge.f32.partialorder %v1727_v45, 0.0  ;;  %v1759_v34 = vmul.f32 0.2, %v1727_v45 }
 0x5f7   :  { %v1568_v37 = vpop.permute.xlu1 %1567  ;;  %v1808_v42 = vsel %vm415_vm3, %v3952_v41, -inf }
 0x5f8   :  { %v1728_v9 = vadd.f32 %v1692_v6, %v1568_v37  ;;  %1809 = vmax.xlane.f32.xlu0 %v1808_v42  ;;  %v1775_v17 = vsel %vm1743_vm7, %v1727_v45, %v1759_v34  ;;  %v1708_v45 = vrot.slane %v1680_v55, %v3532_v7 }
 0x5f9   :  { %v3959_v47 = vadd.f32 %v3939_v23, %v1775_v17 }
 0x5fa   :  { %vm1744_vm8 = vcmp.ge.f32.partialorder %v1728_v9, 0.0  ;;  %v1760_v19 = vmul.f32 0.2, %v1728_v9 }
 0x5fb   :  { %v1575_v49 = vpop.permute.xlu1 %1574  ;;  %v1811_v39 = vsel %vm415_vm3, %v3959_v47, -inf }
 0x5fc   :  { %v1729_v58 = vadd.f32 %v1696_v43, %v1575_v49  ;;  %1812 = vmax.xlane.f32.xlu1 %v1811_v39  ;;  %v1776_v63 = vsel %vm1744_vm8, %v1728_v9, %v1760_v19  ;;  %v1682_v9 = vcombine.high %v3964_v26, %v3964_v26  ;;  %v1832_v19 = vsel %vm415_vm3, %v3997_v28, -inf }
 0x5fd   :  { %v3967_v52 = vadd.f32 %v3949_v59, %v1776_v63 }
 0x5fe   :  { %vm1745_vm9 = vcmp.ge.f32.partialorder %v1729_v58, 0.0  ;;  %v1761_v61 = vmul.f32 0.2, %v1729_v58  ;;  %v1712_v32 = vrot.slane %v1682_v9, %v3532_v7 }
 0x5ff   :  { %v1579_v38 = vpop.permute.xlu1 %1578  ;;  %v1814_v11 = vsel %vm415_vm3, %v3967_v52, -inf }
 0x600   :  { %v1730_v50 = vadd.f32 %v1696_v43, %v1579_v38  ;;  %1815 = vmax.xlane.f32.xlu1 %v1814_v11  ;;  %v1777_v0 = vsel %vm1745_vm9, %v1729_v58, %v1761_v61 }
 0x601   :  { %v3975_v15 = vadd.f32 %v3939_v23, %v1777_v0 }
 0x602   :  { %vm1746_vm10 = vcmp.ge.f32.partialorder %v1730_v50, 0.0  ;;  %v1762_v10 = vmul.f32 0.2, %v1730_v50 }
 0x603   :  { %v1586_v24 = vpop.permute.xlu1 %1585  ;;  %v1817_v57 = vsel %vm415_vm3, %v3975_v15, -inf }
 0x604   :  { %v1731_v18 = vadd.f32 %v1700_v4, %v1586_v24  ;;  %1818 = vmax.xlane.f32.xlu1 %v1817_v57  ;;  %v1778_v8 = vsel %vm1746_vm10, %v1730_v50, %v1762_v10 }
 0x605   :  { %v3980_v14 = vadd.f32 %v3949_v59, %v1778_v8 }
 0x606   :  { %vm1747_vm11 = vcmp.ge.f32.partialorder %v1731_v18, 0.0  ;;  %v1763_v16 = vmul.f32 0.2, %v1731_v18 }
 0x607   :  { %v1590_v35 = vpop.permute.xlu1 %1589  ;;  %v1820_v21 = vsel %vm415_vm3, %v3980_v14, -inf }
 0x608   :  { %v1732_v44 = vadd.f32 %v1700_v4, %v1590_v35  ;;  %1821 = vmax.xlane.f32.xlu0 %v1820_v21  ;;  %v1779_v13 = vsel %vm1747_vm11, %v1731_v18, %v1763_v16  ;;  %v1684_v4 = vcombine.high %v1680_v55, %v1680_v55 }
 0x609   :  { %v3985_v51 = vadd.f32 %v3939_v23, %v1779_v13 }
 0x60a   :  { %vm1748_vm13 = vcmp.ge.f32.partialorder %v1732_v44, 0.0  ;;  %v1764_v22 = vmul.f32 0.2, %v1732_v44  ;;  %v1716_v18 = vrot.slane %v1684_v4, %v3532_v7 }
 0x60b   :  { %v1597_v60 = vpop.permute.xlu1 %1596  ;;  %v1823_v6 = vsel %vm415_vm3, %v3985_v51, -inf }
 0x60c   :  { %v1733_v12 = vadd.f32 %v1704_v54, %v1597_v60  ;;  %1824 = vmax.xlane.f32.xlu1 %v1823_v6  ;;  %v1780_v25 = vsel %vm1748_vm13, %v1732_v44, %v1764_v22 }
 0x60d   :  { %v3991_v31 = vadd.f32 %v3949_v59, %v1780_v25 }
 0x60e   :  { %vm1749_vm14 = vcmp.ge.f32.partialorder %v1733_v12, 0.0  ;;  %v1765_v33 = vmul.f32 0.2, %v1733_v12 }
 0x60f   :  { %v1608_v56 = vpop.permute.xlu1 %1607  ;;  %v1826_v29 = vsel %vm415_vm3, %v3991_v31, -inf }
 0x610   :  { %v1735_v34 = vadd.f32 %v1708_v45, %v1608_v56  ;;  %1827 = vmax.xlane.f32.xlu0 %v1826_v29  ;;  %v1781_v37 = vsel %vm1749_vm14, %v1733_v12, %v1765_v33 }
 0x611   :  { %v4000_v42 = vadd.f32 %v3939_v23, %v1781_v37 }
 0x612   :  { %vm1751_vm15 = vcmp.ge.f32.partialorder %v1735_v34, 0.0  ;;  %v1767_v40 = vmul.f32 0.2, %v1735_v34 }
 0x613   :  { %v1612_v43 = vpop.permute.xlu1 %1611  ;;  %v1829_v17 = vsel %vm415_vm3, %v4000_v42, -inf }
 0x614   :  { %v1736_v49 = vadd.f32 %v1708_v45, %v1612_v43  ;;  %1830 = vmax.xlane.f32.xlu1 %v1829_v17  ;;  %1833 = vmax.xlane.f32.xlu0 %v1832_v19  ;;  %v1783_v39 = vsel %vm1751_vm15, %v1735_v34, %v1767_v40 }
 0x615   :  { %v4009_v58 = vadd.f32 %v3939_v23, %v1783_v39 }
 0x616   :  { %vm1752_vm1 = vcmp.ge.f32.partialorder %v1736_v49, 0.0  ;;  %v1768_v63 = vmul.f32 0.2, %v1736_v49 }
 0x617   :  { %v1619_v61 = vpop.permute.xlu1 %1618  ;;  %v1835_v26 = vsel %vm415_vm3, %v4009_v58, -inf }
 0x618   :  { %v1737_v38 = vadd.f32 %v1712_v32, %v1619_v61  ;;  %1836 = vmax.xlane.f32.xlu1 %v1835_v26  ;;  %v1784_v11 = vsel %vm1752_vm1, %v1736_v49, %v1768_v63 }
 0x619   :  { %v4015_v54 = vadd.f32 %v3949_v59, %v1784_v11 }
 0x61a   :  { %vm1753_vm2 = vcmp.ge.f32.partialorder %v1737_v38, 0.0  ;;  %v1769_v50 = vmul.f32 0.2, %v1737_v38 }
 0x61b   :  { %v1623_v0 = vpop.permute.xlu1 %1622  ;;  %v1838_v48 = vsel %vm415_vm3, %v4015_v54, -inf }
 0x61c   :  { %v1738_v10 = vadd.f32 %v1712_v32, %v1623_v0  ;;  %1839 = vmax.xlane.f32.xlu0 %v1838_v48  ;;  %v1785_v24 = vsel %vm1753_vm2, %v1737_v38, %v1769_v50 }
 0x61d   :  { %v4020_v57 = vadd.f32 %v3939_v23, %v1785_v24 }
 0x61e   :  { %vm1754_vm4 = vcmp.ge.f32.partialorder %v1738_v10, 0.0  ;;  %v1770_v53 = vmul.f32 0.2, %v1738_v10 }
 0x61f   :  { %v1630_v8 = vpop.permute.xlu1 %1629  ;;  %v1841_v1 = vsel %vm415_vm3, %v4020_v57, -inf }
 0x620   :  { %v1739_v16 = vadd.f32 %v1716_v18, %v1630_v8  ;;  %1842 = vmax.xlane.f32.xlu1 %v1841_v1  ;;  %v1786_v35 = vsel %vm1754_vm4, %v1738_v10, %v1770_v53 }
 0x621   :  { %v4026_v21 = vadd.f32 %v3949_v59, %v1786_v35 }
 0x622   :  { %vm1755_vm5 = vcmp.ge.f32.partialorder %v1739_v16, 0.0  ;;  %v1771_v20 = vmul.f32 0.2, %v1739_v16 }
 0x623   :  { %v1634_v44 = vpop.permute.xlu1 %1633  ;;  %v1844_v13 = vsel %vm415_vm3, %v4026_v21, -inf }
 0x624   :  { %v1740_v22 = vadd.f32 %v1716_v18, %v1634_v44  ;;  %1845 = vmax.xlane.f32.xlu0 %v1844_v13  ;;  %v1787_v55 = vsel %vm1755_vm5, %v1739_v16, %v1771_v20 }
 0x625   :  { %v4031_v7 = vadd.f32 %v3939_v23, %v1787_v55 }
 0x626   :  { %vm1756_vm6 = vcmp.ge.f32.partialorder %v1740_v22, 0.0  ;;  %v1772_v60 = vmul.f32 0.2, %v1740_v22 }
 0x627   :  { %v1847_v6 = vsel %vm415_vm3, %v4031_v7, -inf }
 0x628   :  { %1848 = vmax.xlane.f32.xlu1 %v1847_v6  ;;  %v1788_v12 = vsel %vm1756_vm6, %v1740_v22, %v1772_v60 }
 0x629   :  { %v4036_v25 = vadd.f32 %v3949_v59, %v1788_v12 }
 0x62b   :  { %v1850_v30 = vsel %vm415_vm3, %v4036_v25, -inf }
 0x62c   :  { %1851 = vmax.xlane.f32.xlu0 %v1850_v30 }
 0x681   :  { %v1807_v33 = vpop.xlane.xlu1 %1806 }
 0x682   :  { %v1853_v45 = vsub.f32 %v3942_v36, %v1807_v33 }
 0x684   :  { %v1869_v56 = vmul.f32 1.442695, %v1853_v45 }
 0x685   :  { %v1810_v23 = vpop.xlane.xlu0 %1809 }
 0x686   :  { %3390 = vpow2.f32 %v1869_v56  ;;  %v1854_v29 = vsub.f32 %v3952_v41, %v1810_v23 }
 0x688   :  { %v1871_v34 = vmul.f32 1.442695, %v1854_v29 }
 0x689   :  { %v1813_v37 = vpop.xlane.xlu1 %1812 }
 0x68a   :  { %3392 = vpow2.f32 %v1871_v34  ;;  %v1855_v40 = vsub.f32 %v3959_v47, %v1813_v37 }
 0x68c   :  { %v1873_v9 = vmul.f32 1.442695, %v1855_v40 }
 0x68d   :  { %v1816_v59 = vpop.xlane.xlu1 %1815 }
 0x68e   :  { %3394 = vpow2.f32 %v1873_v9  ;;  %v1856_v43 = vsub.f32 %v3967_v52, %v1816_v59 }
 0x690   :  { %v4044_v17 = vpop.eup %3390  ;;  %v1875_v19 = vmul.f32 1.442695, %v1856_v43 }
 0x691   :  { %v1819_v49 = vpop.xlane.xlu1 %1818  ;;  %v1901_v36 = vsel %vm415_vm3, %v4044_v17, 0.0 }
 0x692   :  { %3396 = vpow2.f32 %v1875_v19  ;;  %v1857_v41 = vsub.f32 %v3975_v15, %v1819_v49  ;;  %1902 = vadd.xlane.f32.xlu1 %v1901_v36 }
 0x694   :  { %v4049_v39 = vpop.eup %3392  ;;  %v1877_v63 = vmul.f32 1.442695, %v1857_v41 }
 0x695   :  { %v1822_v47 = vpop.xlane.xlu0 %1821  ;;  %v1904_v32 = vsel %vm415_vm3, %v4049_v39, 0.0 }
 0x696   :  { %3398 = vpow2.f32 %v1877_v63  ;;  %v1858_v52 = vsub.f32 %v3980_v14, %v1822_v47  ;;  %1905 = vadd.xlane.f32.xlu0 %v1904_v32 }
 0x698   :  { %v4054_v61 = vpop.eup %3394  ;;  %v1879_v26 = vmul.f32 1.442695, %v1858_v52 }
 0x699   :  { %v1825_v38 = vpop.xlane.xlu1 %1824  ;;  %v1907_v11 = vsel %vm415_vm3, %v4054_v61, 0.0 }
 0x69a   :  { %3400 = vpow2.f32 %v1879_v26  ;;  %v1859_v15 = vsub.f32 %v3985_v51, %v1825_v38  ;;  %1908 = vadd.xlane.f32.xlu1 %v1907_v11 }
 0x69c   :  { %v4059_v50 = vpop.eup %3396  ;;  %v1881_v4 = vmul.f32 1.442695, %v1859_v15 }
 0x69d   :  { %v1828_v0 = vpop.xlane.xlu0 %1827  ;;  %v1910_v48 = vsel %vm415_vm3, %v4059_v50, 0.0 }
 0x69e   :  { %3402 = vpow2.f32 %v1881_v4  ;;  %v1860_v14 = vsub.f32 %v3991_v31, %v1828_v0  ;;  %1911 = vadd.xlane.f32.xlu0 %v1910_v48 }
 0x6a0   :  { %v4064_v10 = vpop.eup %3398  ;;  %v1883_v24 = vmul.f32 1.442695, %v1860_v14 }
 0x6a1   :  { %v1831_v53 = vpop.xlane.xlu1 %1830  ;;  %v1834_v18 = vpop.xlane.xlu0 %1833  ;;  %v1913_v51 = vsel %vm415_vm3, %v4064_v10, 0.0 }
 0x6a2   :  { %3404 = vpow2.f32 %v1883_v24  ;;  %v1861_v8 = vsub.f32 %v4000_v42, %v1831_v53  ;;  %v1862_v1 = vsub.f32 %v3997_v28, %v1834_v18  ;;  %1914 = vadd.xlane.f32.xlu1 %v1913_v51 }
 0x6a4   :  { %v4070_v16 = vpop.eup %3400  ;;  %v1885_v35 = vmul.f32 1.442695, %v1861_v8  ;;  %v1887_v20 = vmul.f32 1.442695, %v1862_v1 }
 0x6a5   :  { %v1837_v31 = vpop.xlane.xlu1 %1836  ;;  %v1916_v44 = vsel %vm415_vm3, %v4070_v16, 0.0 }
 0x6a6   :  { %3406 = vpow2.f32 %v1885_v35  ;;  %v1863_v13 = vsub.f32 %v4009_v58, %v1837_v31  ;;  %1917 = vadd.xlane.f32.xlu0 %v1916_v44 }
 0x6a7   :  { %3408 = vpow2.f32 %v1887_v20 }
 0x6a8   :  { %v4075_v22 = vpop.eup %3402  ;;  %v1889_v55 = vmul.f32 1.442695, %v1863_v13 }
 0x6a9   :  { %v1840_v42 = vpop.xlane.xlu0 %1839  ;;  %v1919_v28 = vsel %vm415_vm3, %v4075_v22, 0.0 }
 0x6aa   :  { %3410 = vpow2.f32 %v1889_v55  ;;  %v1864_v60 = vsub.f32 %v4015_v54, %v1840_v42  ;;  %1920 = vadd.xlane.f32.xlu1 %v1919_v28 }
 0x6ac   :  { %v4080_v6 = vpop.eup %3404  ;;  %v1891_v12 = vmul.f32 1.442695, %v1864_v60 }
 0x6ad   :  { %v1843_v30 = vpop.xlane.xlu1 %1842  ;;  %v1922_v58 = vsel %vm415_vm3, %v4080_v6, 0.0 }
 0x6ae   :  { %3412 = vpow2.f32 %v1891_v12  ;;  %v1865_v33 = vsub.f32 %v4020_v57, %v1843_v30  ;;  %1923 = vadd.xlane.f32.xlu0 %v1922_v58 }
 0x6b0   :  { %v4085_v45 = vpop.eup %3406  ;;  %v1893_v56 = vmul.f32 1.442695, %v1865_v33 }
 0x6b1   :  { %v4087_v23 = vpop.eup %3408  ;;  %v1846_v29 = vpop.xlane.xlu0 %1845  ;;  %v1925_v54 = vsel %vm415_vm3, %v4085_v45, 0.0 }
 0x6b2   :  { %3414 = vpow2.f32 %v1893_v56  ;;  %v1866_v34 = vsub.f32 %v4026_v21, %v1846_v29  ;;  %1926 = vadd.xlane.f32.xlu1 %v1925_v54  ;;  %v1928_v37 = vsel %vm415_vm3, %v4087_v23, 0.0 }
 0x6b3   :  { %1929 = vadd.xlane.f32.xlu0 %v1928_v37 }
 0x6b4   :  { %v4094_v40 = vpop.eup %3410  ;;  %v1895_v57 = vmul.f32 1.442695, %v1866_v34 }
 0x6b5   :  { %v1849_v9 = vpop.xlane.xlu1 %1848  ;;  %v1931_v59 = vsel %vm415_vm3, %v4094_v40, 0.0 }
 0x6b6   :  { %3416 = vpow2.f32 %v1895_v57  ;;  %v1867_v43 = vsub.f32 %v4031_v7, %v1849_v9  ;;  %1932 = vadd.xlane.f32.xlu1 %v1931_v59 }
 0x6b8   :  { %v4099_v19 = vpop.eup %3412  ;;  %v1897_v49 = vmul.f32 1.442695, %v1867_v43  ;;  %v2812_v43 = vld [vmem:[%s4224_s9 + $0x8] sm:$0xff] }
 0x6b9   :  { %v1852_v21 = vpop.xlane.xlu0 %1851  ;;  %v1934_v36 = vsel %vm415_vm3, %v4099_v19, 0.0 }
 0x6ba   :  { %3418 = vpow2.f32 %v1897_v49  ;;  %v1868_v41 = vsub.f32 %v4036_v25, %v1852_v21  ;;  %1935 = vadd.xlane.f32.xlu0 %v1934_v36  ;;  %v2813_v49 = vld [vmem:[%s4224_s9 + $0x10] sm:$0xff]  ;;  %v2814_v21 = vld [vmem:[%s4224_s9 + $0x18] sm:$0xff]  ;;  %v2815_v36 = vld [vmem:[%s4224_s9 + $0x20] sm:$0xff] }
 0x6bc   :  { %v4104_v63 = vpop.eup %3414  ;;  %v1899_v47 = vmul.f32 1.442695, %v1868_v41  ;;  %v3312_v41 = vpack.c.bf16 %v2814_v21, %v2813_v49 }
 0x6bd   :  { %v1937_v32 = vsel %vm415_vm3, %v4104_v63, 0.0 }
 0x6be   :  { %3420 = vpow2.f32 %v1899_v47  ;;  %1938 = vadd.xlane.f32.xlu1 %v1937_v32  ;;  %v2817_v32 = vld [vmem:[%s4224_s9 + $0x30] sm:$0xff] }
 0x6c0   :  { %v4108_v7 = vpop.eup %3416 }
 0x6c1   :  { %v1940_v52 = vsel %vm415_vm3, %v4108_v7, 0.0 }
 0x6c2   :  { %1941 = vadd.xlane.f32.xlu0 %v1940_v52 }
 0x6c4   :  { %v4112_v26 = vpop.eup %3418 }
 0x6c5   :  { %v1943_v25 = vsel %vm415_vm3, %v4112_v26, 0.0 }
 0x6c6   :  { %1944 = vadd.xlane.f32.xlu1 %v1943_v25 }
 0x6c8   :  { %v4116_v38 = vpop.eup %3420 }
 0x6c9   :  { %v1946_v11 = vsel %vm415_vm3, %v4116_v38, 0.0 }
 0x6ca   :  { %1947 = vadd.xlane.f32.xlu0 %v1946_v11 }
 0x71f   :  { %v1903_v15 = vpop.xlane.xlu1 %1902 }
 0x720   :  { %3422 = vrcp.f32 %v1903_v15 }
 0x723   :  { %v1906_v4 = vpop.xlane.xlu0 %1905 }
 0x724   :  { %3424 = vrcp.f32 %v1906_v4 }
 0x727   :  { %v1909_v0 = vpop.xlane.xlu1 %1908 }
 0x728   :  { %3426 = vrcp.f32 %v1909_v0 }
 0x72a   :  { %v3423_v48 = vpop.eup %3422 }
 0x72b   :  { %v1912_v14 = vpop.xlane.xlu0 %1911  ;;  %v1965_v24 = vmul.f32 %v3423_v48, %v4044_v17 }
 0x72c   :  { %3428 = vrcp.f32 %v1912_v14 }
 0x72d   :  { %3157 = vmatprep.mubr.msk.f32.mxu0 %vm415_vm3, %v1965_v24 }
 0x72e   :  { %v3425_v53 = vpop.eup %3424 }
 0x72f   :  { %v1966_v18 = vmul.f32 %v3425_v53, %v4049_v39  ;;  %v1915_v51 = vpop.xlane.xlu1 %1914 }
 0x730   :  { %3430 = vrcp.f32 %v1915_v51 }
 0x731   :  { %3158 = vmatmul.mubr.msk.f32.vlgmr.msra.gmra.mrb[10].mxu0 %vm415_vm3, %v1966_v18 }
 0x732   :  { %v3427_v8 = vpop.eup %3426  ;;  %3287 = vmatpush3.bf16.msra.mxu0 %v3902_v62 }
 0x733   :  { %3293 = vmatprep.subr.bf16.mxu0 %v3906_v2  ;;  %v1918_v1 = vpop.xlane.xlu0 %1917  ;;  %v1967_v35 = vmul.f32 %v3427_v8, %v4054_v61 }
 0x734   :  { %3432 = vrcp.f32 %v1918_v1 }
 0x735   :  { %3164 = vmatprep.mubr.msk.f32.mxu1 %vm415_vm3, %v1967_v35 }
 0x736   :  { %v3429_v17 = vpop.eup %3428 }
 0x737   :  { %v1968_v20 = vmul.f32 %v3429_v17, %v4059_v50  ;;  %v1921_v31 = vpop.xlane.xlu1 %1920 }
 0x738   :  { %3434 = vrcp.f32 %v1921_v31 }
 0x739   :  { %3165 = vmatmul.mubr.msk.f32.vlgmr.msra.gmra.mrb[14].mxu1 %vm415_vm3, %v1968_v20 }
 0x73a   :  { %v3431_v39 = vpop.eup %3430  ;;  %3291 = vmatpush3.bf16.msra.mxu1 %v3904_v46 }
 0x73b   :  { %3297 = vmatprep.subr.bf16.mxu1 %v3908_v3  ;;  %v1924_v62 = vpop.xlane.xlu0 %1923  ;;  %v1969_v44 = vmul.f32 %v3431_v39, %v4064_v10 }
 0x73c   :  { %3436 = vrcp.f32 %v1924_v62 }
 0x73d   :  { %3171 = vmatprep.mubr.msk.f32.mxu0 %vm415_vm3, %v1969_v44 }
 0x73e   :  { %v3433_v61 = vpop.eup %3432 }
 0x73f   :  { %v1970_v13 = vmul.f32 %v3433_v61, %v4070_v16  ;;  %v1927_v55 = vpop.xlane.xlu1 %1926 }
 0x740   :  { %3438 = vrcp.f32 %v1927_v55  ;;  %v1930_v50 = vpop.xlane.xlu0 %1929 }
 0x741   :  { %3440 = vrcp.f32 %v1930_v50  ;;  %3172 = vmatmul.mubr.msk.f32.vlgmr.msra.gmra.mrb[12].mxu0 %vm415_vm3, %v1970_v13 }
 0x742   :  { %v3435_v42 = vpop.eup %3434  ;;  %3295 = vmatpush3.bf16.msra.mxu0 %v3906_v2 }
 0x743   :  { %3301 = vmatprep.subr.bf16.mxu0 %v3910_v5  ;;  %v1933_v46 = vpop.xlane.xlu1 %1932  ;;  %v1971_v10 = vmul.f32 %v3435_v42, %v4075_v22 }
 0x744   :  { %3442 = vrcp.f32 %v1933_v46 }
 0x745   :  { %3178 = vmatprep.mubr.msk.f32.mxu1 %vm415_vm3, %v1971_v10 }
 0x746   :  { %v3437_v28 = vpop.eup %3436 }
 0x747   :  { %v1972_v16 = vmul.f32 %v3437_v28, %v4080_v6  ;;  %v1936_v60 = vpop.xlane.xlu0 %1935 }
 0x748   :  { %3444 = vrcp.f32 %v1936_v60 }
 0x749   :  { %3179 = vmatmul.mubr.msk.f32.vlgmr.msra.gmra.mrb[16].mxu1 %vm415_vm3, %v1972_v16 }
 0x74a   :  { %v3439_v12 = vpop.eup %3438  ;;  %3299 = vmatpush3.bf16.msra.mxu1 %v3908_v3 }
 0x74b   :  { %v3441_v30 = vpop.eup %3440  ;;  %3305 = vmatprep.subr.bf16.mxu1 %v3914_v27  ;;  %v1939_v2 = vpop.xlane.xlu1 %1938  ;;  %v1973_v58 = vmul.f32 %v3439_v12, %v4085_v45 }
 0x74c   :  { %v1974_v22 = vmul.f32 %v3441_v30, %v4087_v23  ;;  %3446 = vrcp.f32 %v1939_v2 }
 0x74d   :  { %3185 = vmatprep.mubr.msk.f32.mxu0 %vm415_vm3, %v1973_v58 }
 0x74e   :  { %v3443_v33 = vpop.eup %3442  ;;  %3186 = vmatmul.mubr.msk.f32.vlgmr.msra.gmra.mrb[14].mxu0 %vm415_vm3, %v1974_v22 }
 0x74f   :  { %3303 = vmatpush3.bf16.msra.mxu0 %v3910_v5  ;;  %v1942_v6 = vpop.xlane.xlu0 %1941  ;;  %v1975_v56 = vmul.f32 %v3443_v33, %v4094_v40 }
 0x750   :  { %3448 = vrcp.f32 %v1942_v6 }
 0x751   :  { %3192 = vmatprep.mubr.msk.f32.mxu1 %vm415_vm3, %v1975_v56 }
 0x752   :  { %v3445_v3 = vpop.eup %3444 }
 0x753   :  { %v1976_v29 = vmul.f32 %v3445_v3, %v4099_v19  ;;  %v1945_v45 = vpop.xlane.xlu1 %1944 }
 0x754   :  { %3450 = vrcp.f32 %v1945_v45 }
 0x755   :  { %3193 = vmatmul.mubr.msk.f32.vlgmr.msra.gmra.mrb[18].mxu1 %vm415_vm3, %v1976_v29 }
 0x756   :  { %v3447_v23 = vpop.eup %3446  ;;  %3307 = vmatpush3.bf16.msra.mxu1 %v3914_v27  ;;  %v2811_v27 = vld [vmem:[%s4224_s9] sm:$0xff] }
 0x757   :  { %v1948_v54 = vpop.xlane.xlu0 %1947  ;;  %v1977_v34 = vmul.f32 %v3447_v23, %v4104_v63  ;;  %v3308_v19 = vpack.c.bf16 %v2812_v43, %v2811_v27  ;;  %v2816_v63 = vld [vmem:[%s4224_s9 + $0x28] sm:$0xff] }
 0x758   :  { %3452 = vrcp.f32 %v1948_v54  ;;  %v3316_v47 = vpack.c.bf16 %v2816_v63, %v2815_v36 }
 0x759   :  { %3199 = vmatprep.mubr.msk.f32.mxu0 %vm415_vm3, %v1977_v34  ;;  %3309 = vmatprep.subr.bf16.mxu0 %v3308_v19 }
 0x75a   :  { %v3449_v5 = vpop.eup %3448 }
 0x75b   :  { %v1978_v37 = vmul.f32 %v3449_v5, %v4108_v7  ;;  %v2818_v7 = vld [vmem:[%s4224_s9 + $0x38] sm:$0xff]  ;;  %v2970_v5 = vld [vmem:[%s4225_s10] ss:$0 sm:$0xff] }
 0x75c   :  { %v3320_v52 = vpack.c.bf16 %v2818_v7, %v2817_v32 }
 0x75d   :  { %3200 = vmatmul.mubr.msk.f32.vlgmr.msra.gmra.mrb[16].mxu0 %vm415_vm3, %v1978_v37 }
 0x75e   :  { %v3451_v40 = vpop.eup %3450  ;;  %3311 = vmatpush3.bf16.msra.mxu0 %v3308_v19 }
 0x75f   :  { %v1979_v57 = vmul.f32 %v3451_v40, %v4112_v26  ;;  %3313 = vmatprep.subr.bf16.mxu0 %v3312_v41 }
 0x761   :  { %3206 = vmatprep.mubr.msk.f32.mxu1 %vm415_vm3, %v1979_v57 }
 0x762   :  { %v3453_v9 = vpop.eup %3452  ;;  %3315 = vmatpush3.bf16.msra.mxu0 %v3312_v41 }
 0x763   :  { %v1980_v59 = vmul.f32 %v3453_v9, %v4116_v38  ;;  %3317 = vmatprep.subr.bf16.mxu0 %v3316_v47 }
 0x765   :  { %3207 = vmatmul.mubr.msk.f32.vlgmr.msra.gmra.mrb[20].mxu1 %vm415_vm3, %v1980_v59  ;;  %vm2780_vm3 = vcmask 523264  }
 0x766   :  { %3319 = vmatpush3.bf16.msra.mxu0 %v3316_v47 }
 0x767   :  { %3321 = vmatprep.subr.bf16.mxu0 %v3320_v52 }
 0x76a   :  { %3323 = vmatpush3.bf16.msra.mxu0 %v3320_v52 }
 0x804   :  { %v3159_v26 = vpop.f32.mrb[10].mxu0 }
 0x805   :  { %v2204_v25 = vpop.f32.mrb[11].mxu0  ;;  %v2796_v11 = vsel %vm2780_vm3, %v3159_v26, 0.0 }
 0x806   :  { %v2781_v0 = vsel %vm2780_vm3, %v2204_v25, 0.0 }
 0x80c   :  { %v3166_v38 = vpop.f32.mrb[14].mxu1 }
 0x80d   :  { %v2797_v15 = vsel %vm2780_vm3, %v3166_v38, 0.0  ;;  %v2285_v4 = vpop.f32.mrb[15].mxu1 }
 0x80e   :  { %v2798_v48 = vadd.f32 %v2797_v15, %v2796_v11  ;;  %v2782_v14 = vsel %vm2780_vm3, %v2285_v4, 0.0 }
 0x80f   :  { %v2783_v24 = vadd.f32 %v2782_v14, %v2781_v0 }
 0x814   :  { %v3173_v53 = vpop.f32.mrb[12].mxu0 }
 0x815   :  { %v2799_v18 = vsel %vm2780_vm3, %v3173_v53, 0.0  ;;  %v2366_v51 = vpop.f32.mrb[13].mxu0 }
 0x816   :  { %v2800_v8 = vadd.f32 %v2799_v18, %v2798_v48  ;;  %v2784_v1 = vsel %vm2780_vm3, %v2366_v51, 0.0 }
 0x817   :  { %v2785_v35 = vadd.f32 %v2784_v1, %v2783_v24 }
 0x81c   :  { %v3180_v17 = vpop.f32.mrb[16].mxu1 }
 0x81d   :  { %v2801_v20 = vsel %vm2780_vm3, %v3180_v17, 0.0  ;;  %v2447_v31 = vpop.f32.mrb[17].mxu1 }
 0x81e   :  { %v2802_v39 = vadd.f32 %v2801_v20, %v2800_v8  ;;  %v2786_v62 = vsel %vm2780_vm3, %v2447_v31, 0.0 }
 0x81f   :  { %v2787_v44 = vadd.f32 %v2786_v62, %v2785_v35 }
 0x821   :  { %v3187_v61 = vpop.f32.mrb[14].mxu0 }
 0x822   :  { %v2803_v13 = vsel %vm2780_vm3, %v3187_v61, 0.0  ;;  %v2528_v55 = vpop.f32.mrb[15].mxu0 }
 0x823   :  { %v2804_v50 = vadd.f32 %v2803_v13, %v2802_v39  ;;  %v2788_v42 = vsel %vm2780_vm3, %v2528_v55, 0.0 }
 0x824   :  { %v2789_v46 = vadd.f32 %v2788_v42, %v2787_v44 }
 0x828   :  { %v3194_v10 = vpop.f32.mrb[18].mxu1 }
 0x829   :  { %v2805_v28 = vsel %vm2780_vm3, %v3194_v10, 0.0  ;;  %v2609_v16 = vpop.f32.mrb[19].mxu1 }
 0x82a   :  { %v2806_v60 = vadd.f32 %v2805_v28, %v2804_v50  ;;  %v2790_v12 = vsel %vm2780_vm3, %v2609_v16, 0.0 }
 0x82b   :  { %v2791_v30 = vadd.f32 %v2790_v12, %v2789_v46 }
 0x830   :  { %v3201_v2 = vpop.f32.mrb[16].mxu0 }
 0x831   :  { %v2807_v58 = vsel %vm2780_vm3, %v3201_v2, 0.0  ;;  %v2690_v22 = vpop.f32.mrb[17].mxu0 }
 0x832   :  { %v2808_v33 = vadd.f32 %v2807_v58, %v2806_v60  ;;  %v2792_v6 = vsel %vm2780_vm3, %v2690_v22, 0.0 }
 0x833   :  { %v2793_v56 = vadd.f32 %v2792_v6, %v2791_v30 }
 0x838   :  { %v3208_v3 = vpop.f32.mrb[20].mxu1 }
 0x839   :  { %v2809_v29 = vsel %vm2780_vm3, %v3208_v3, 0.0  ;;  %v2771_v45 = vpop.f32.mrb[21].mxu1 }
 0x83a   :  { %v2810_v23 = vadd.f32 %v2809_v29, %v2808_v33  ;;  %v2794_v54 = vsel %vm2780_vm3, %v2771_v45, 0.0 }
 0x83b   :  { %v2795_v34 = vadd.f32 %v2794_v54, %v2793_v56 }
 0x83d   :  { %3225 = vmatprep.mubr.msk.f32.mxu0 %vm2780_vm3, %v2795_v34 }
 0x83e   :  { %3226 = vmatmul.mubr.msk.f32.vlgmr.msra.gmra.mrb[18].mxu0 %vm2780_vm3, %v2810_v23 }
 0x911   :  { %v3227_v37 = vpop.f32.mrb[18].mxu0 }
 0x912   :  { %v2904_v40 = vadd.f32 %v3227_v37, %v2970_v5  ;;  %v2898_v57 = vpop.f32.mrb[19].mxu0 }
 0x913   :  { %v2899_v9 = vadd.f32 %v2970_v5, %v2898_v57 }
 0x914   :  { %2908 = vst.msk [vmem:[%s4226_s11 + $0x8] sm:$0xff] %vm43_vm0, %v2904_v40 }
 0x915   :  { %2907 = vst.msk [vmem:[%s4226_s11] sm:$0xff] %vm43_vm0, %v2899_v9 }

</bundles_post_ra>
